<compile_context>
chip_gen: v7x
topology: tpu7x:2x2x1
jax: 0.10.0
libtpu: 0.0.40
codegen_flags: <defaults>
</compile_context>

<pallas_src>
import functools
import math

import jax
import jax.numpy as jnp
from jax.experimental import pallas as pl
from jax.experimental.pallas import tpu as pltpu


def _attention_body(xq, xkv, wq_ref, bq_ref, wk_ref, bk_ref, wv_ref, bv_ref,
                    wd_ref, bd_ref, o_ref, ctx_ref, *, num_heads, head_dim):
    """Full MHA for one fused batch block.  xq:(TB,Sq,D), xkv:(TB,Skv,D) bf16."""
    TB, Sq, D = xq.shape
    Skv = xkv.shape[1]
    xq2 = xq.reshape(TB * Sq, D)      # M-dim = TB*Sq rows for the MXU
    xkv2 = xkv.reshape(TB * Skv, D)

    # Static unroll over heads: all weight / context slices are static and
    # lane-aligned; activations and weights stay VMEM-resident across heads.
    for h in range(num_heads):
        cs = slice(h * head_dim, (h + 1) * head_dim)

        # Per-head projections: bf16 MXU matmuls with K=D, f32 accumulation.
        q = (jnp.dot(xq2, wq_ref[:, cs], preferred_element_type=jnp.float32)
             + bq_ref[:, cs]).reshape(TB, Sq, head_dim).astype(jnp.bfloat16)
        k = (jnp.dot(xkv2, wk_ref[:, cs], preferred_element_type=jnp.float32)
             + bk_ref[:, cs]).reshape(TB, Skv, head_dim).astype(jnp.bfloat16)
        v = (jnp.dot(xkv2, wv_ref[:, cs], preferred_element_type=jnp.float32)
             + bv_ref[:, cs]).reshape(TB, Skv, head_dim).astype(jnp.bfloat16)

        # Scaled scores (1/sqrt(head_dim) folded into Wq/bq in prepare_params);
        # softmax in f32, max-subtracted for stability.
        s = jnp.einsum("bqd,bkd->bqk", q, k, preferred_element_type=jnp.float32)
        m = jnp.max(s, axis=-1, keepdims=True)
        e = jnp.exp(s - m)
        p = e * pl.reciprocal(jnp.sum(e, axis=-1, keepdims=True), approx=True)
        # TODO(synk): nn.Dropout(p=0.1) on attention_probs is inference-mode identity.

        ctx = jnp.einsum("bqk,bkd->bqd", p.astype(jnp.bfloat16), v,
                         preferred_element_type=jnp.float32)

        # Pack this head's context into its dh-wide column of the bf16 context
        # scratch (static slice) -> the dense projection below is a single
        # K=D matmul instead of H shallow-K matmuls + f32 accumulator RMW.
        ctx_ref[:, cs] = ctx.reshape(TB * Sq, head_dim).astype(jnp.bfloat16)

    out = (jnp.dot(ctx_ref[...], wd_ref[...], preferred_element_type=jnp.float32)
           + bd_ref[...])
    o_ref[...] = out.reshape(TB, Sq, D).astype(o_ref.dtype)


def _mha_self_kernel(x_ref, *rest, num_heads, head_dim):
    x = x_ref[...]                    # loaded once, reused for Q and K/V
    _attention_body(x, x, *rest, num_heads=num_heads, head_dim=head_dim)


def _mha_cross_kernel(xq_ref, xkv_ref, *rest, num_heads, head_dim):
    _attention_body(xq_ref[...], xkv_ref[...], *rest,
                    num_heads=num_heads, head_dim=head_dim)


def prepare_params(params, *, num_heads):
    """Per-parameter-set prep (hoisted out of the forward path; run ONCE).

    Casts weights to bf16 and folds the 1/sqrt(head_dim) attention scale into
    Wq / bq.  Weights are stored (in, out) for `x @ W`."""
    wq, bq, wk, bk, wv, bv, wd, bd = params
    D = wq.shape[0]
    dh = D // num_heads
    scale = 1.0 / math.sqrt(dh)
    f32 = jnp.float32
    return (
        (wq * scale).astype(jnp.bfloat16), (bq * scale).astype(f32).reshape(1, D),
        wk.astype(jnp.bfloat16), bk.astype(f32).reshape(1, D),
        wv.astype(jnp.bfloat16), bv.astype(f32).reshape(1, D),
        wd.astype(jnp.bfloat16), bd.astype(f32).reshape(1, D),
    )


def _choose_block_b(batch, seq_q):
    """Fuse batch rows so the projection matmuls' M-dim is >= ~512 rows
    (v5e MXU = 4x128^2, v6e/v7x = 2x256^2) while dividing the batch evenly."""
    tb = max(1, min(batch, max(1, 512 // max(seq_q, 1))))
    while batch % tb:
        tb -= 1
    return tb


def multi_head_attention(hidden_states, prepped_params, *, num_heads,
                         other_hidden_states=None, block_b=None):
    """hidden_states: (B, Skv, D) -> (B, Sq, D).

    If `other_hidden_states` is given (self_attention=False path), queries come
    from it; keys/values always come from hidden_states."""
    wq, bq, wk, bk, wv, bv, wd, bd = prepped_params
    B, Skv, D = hidden_states.shape
    assert D % num_heads == 0
    dh = D // num_heads

    # Activations travel to the kernel in bf16 (half the HBM DMA bytes); the
    # kernel never re-casts them (the MXU consumes bf16 directly).
    xkv = (hidden_states if hidden_states.dtype == jnp.bfloat16
           else hidden_states.astype(jnp.bfloat16))
    if other_hidden_states is None:
        xq, Sq = None, Skv
    else:
        assert other_hidden_states.shape[0] == B
        assert other_hidden_states.shape[-1] == D
        Sq = other_hidden_states.shape[1]
        xq = (other_hidden_states if other_hidden_states.dtype == jnp.bfloat16
              else other_hidden_states.astype(jnp.bfloat16))

    TB = _choose_block_b(B, Sq) if block_b is None else block_b
    assert B % TB == 0
    grid = (B // TB,)

    # Weights: grid-invariant full-array blocks (constant index_map) -> fetched
    # into VMEM once for the whole kernel.  All-weight residency is 8*D^2 bytes
    # of bf16, fine up to D ~ 2048.
    # TODO(synk): for very large D fall back to per-head weight blocking, and
    # for long sequences add query tiling + flash-style online softmax (VMEM
    # here scales as O(TB*S*D) + O(TB*S^2)).
    w_spec = pl.BlockSpec((D, D), lambda b: (0, 0))
    b_spec = pl.BlockSpec((1, D), lambda b: (0, 0))
    x_kv_spec = pl.BlockSpec((TB, Skv, D), lambda b: (b, 0, 0))
    x_q_spec = pl.BlockSpec((TB, Sq, D), lambda b: (b, 0, 0))
    o_spec = pl.BlockSpec((TB, Sq, D), lambda b: (b, 0, 0))

    weight_specs = [w_spec, b_spec, w_spec, b_spec, w_spec, b_spec, w_spec, b_spec]
    weight_args = (wq, bq, wk, bk, wv, bv, wd, bd)

    if xq is None:
        kernel = functools.partial(_mha_self_kernel, num_heads=num_heads, head_dim=dh)
        in_specs = [x_kv_spec] + weight_specs
        args = (xkv,) + weight_args
    else:
        kernel = functools.partial(_mha_cross_kernel, num_heads=num_heads, head_dim=dh)
        in_specs = [x_q_spec, x_kv_spec] + weight_specs
        args = (xq, xkv) + weight_args

    return pl.pallas_call(
        kernel,
        out_shape=jax.ShapeDtypeStruct((B, Sq, D), hidden_states.dtype),
        grid_spec=pltpu.PrefetchScalarGridSpec(
            num_scalar_prefetch=0,
            grid=grid,
            in_specs=in_specs,
            out_specs=o_spec,
            # Packed bf16 context buffer for the single K=D output projection.
            scratch_shapes=[pltpu.VMEM((TB * Sq, D), jnp.bfloat16)],
        ),
        compiler_params=pltpu.CompilerParams(
            dimension_semantics=("parallel",),
            # Actual use here is tiny; 64 MiB leaves headroom on v5e/v6e and
            # stays within v7x's physical VMEM.
            vmem_limit_bytes=64 * 1024 * 1024,
        ),
    )(*args)


def _init_linear(key, fan_in, fan_out):
    """PyTorch nn.Linear default init: U(-1/sqrt(fan_in), +1/sqrt(fan_in)).
    Weight already transposed to (fan_in, fan_out) for x @ W."""
    kw, kb = jax.random.split(key)
    bound = 1.0 / math.sqrt(fan_in)
    w = jax.random.uniform(kw, (fan_in, fan_out), jnp.float32, -bound, bound)
    b = jax.random.uniform(kb, (fan_out,), jnp.float32, -bound, bound)
    return w, b


def init_params(key, model_dim):
    kq, kk, kv, kd = jax.random.split(key, 4)
    wq, bq = _init_linear(kq, model_dim, model_dim)
    wk, bk = _init_linear(kk, model_dim, model_dim)
    wv, bv = _init_linear(kv, model_dim, model_dim)
    wd, bd = _init_linear(kd, model_dim, model_dim)
    return (wq, bq, wk, bk, wv, bv, wd, bd)


def _reference(hidden_states, params, num_heads, other_hidden_states=None):
    """Pure-JAX f32 reference mirroring the PyTorch module (dropout in eval)."""
    wq, bq, wk, bk, wv, bv, wd, bd = params
    B, S, D = hidden_states.shape
    dh = D // num_heads
    q_src = hidden_states if other_hidden_states is None else other_hidden_states
    Sq = q_src.shape[1]

    def split_heads(x, seq):
        return x.reshape(B, seq, num_heads, dh).transpose(0, 2, 1, 3)

    q = split_heads(q_src @ wq + bq, Sq)
    k = split_heads(hidden_states @ wk + bk, S)
    v = split_heads(hidden_states @ wv + bv, S)
    s = jnp.einsum("bhqd,bhkd->bhqk", q, k) / math.sqrt(dh)
    p = jax.nn.softmax(s, axis=-1)
    ctx = jnp.einsum("bhqk,bhkd->bhqd", p, v)
    ctx = ctx.transpose(0, 2, 1, 3).reshape(B, Sq, D)
    return ctx @ wd + bd


if __name__ == "__main__":
    key = jax.random.PRNGKey(0)
    kx, ko, kp = jax.random.split(key, 3)

    # Small shapes consistent with the module (model_dim divisible by heads),
    # lane-dense: model_dim=256, heads=2 -> head_dim=128.
    B, S, model_dim, heads = 2, 16, 256, 2

    hidden_states = jax.random.normal(kx, (B, S, model_dim), jnp.float32)
    params = init_params(kp, model_dim)
    prepped = prepare_params(params, num_heads=heads)   # hoisted: once per param set

    # Self-attention path (module default).
    out = multi_head_attention(hidden_states, prepped, num_heads=heads)
    out = jax.block_until_ready(out)
    ref = _reference(hidden_states, params, heads)
    assert out.shape == (B, S, model_dim)
    max_err = float(jnp.max(jnp.abs(out - ref)))
    assert jnp.allclose(out, ref, atol=2e-2, rtol=2e-2), max_err

    # Cross-attention path (self_attention=False): queries from other_hidden_states.
    Sq = 8
    other = jax.random.normal(ko, (B, Sq, model_dim), jnp.float32)
    out_x = multi_head_attention(hidden_states, prepped, num_heads=heads,
                                 other_hidden_states=other)
    out_x = jax.block_until_ready(out_x)
    ref_x = _reference(hidden_states, params, heads, other_hidden_states=other)
    assert out_x.shape == (B, Sq, model_dim)
    max_err_x = float(jnp.max(jnp.abs(out_x - ref_x)))
    assert jnp.allclose(out_x, ref_x, atol=2e-2, rtol=2e-2), max_err_x

    print("KERNEL_OK")
</pallas_src>

<mosaic_0001>
module attributes {stable_mosaic.version = 11 : i64} {
  func.func @_mha_self_kernel(%arg0: i32, %arg1: memref<2x16x256xbf16, #tpu.memory_space<vmem>>, %arg2: memref<256x256xbf16, #tpu.memory_space<vmem>>, %arg3: memref<1x256xf32, #tpu.memory_space<vmem>>, %arg4: memref<256x256xbf16, #tpu.memory_space<vmem>>, %arg5: memref<1x256xf32, #tpu.memory_space<vmem>>, %arg6: memref<256x256xbf16, #tpu.memory_space<vmem>>, %arg7: memref<1x256xf32, #tpu.memory_space<vmem>>, %arg8: memref<256x256xbf16, #tpu.memory_space<vmem>>, %arg9: memref<1x256xf32, #tpu.memory_space<vmem>>, %arg10: memref<2x16x256xf32, #tpu.memory_space<vmem>>, %arg11: memref<32x256xbf16, #tpu.memory_space<vmem>>) attributes {dimension_semantics = [#tpu.dimension_semantics<parallel>], iteration_bounds = array<i64: 1>, scalar_prefetch = 0 : i64, scratch_operands = 1 : i64, tpu.core_type = #tpu.core_type<tc>, window_params = [{transform_indices = @transform_0, window_bounds = array<i64: 2, 16, 256>}, {pipeline_mode = #tpu.pipeline_mode<synchronous>, transform_indices = @transform_1, window_bounds = array<i64: 256, 256>}, {pipeline_mode = #tpu.pipeline_mode<synchronous>, transform_indices = @transform_2, window_bounds = array<i64: 1, 256>}, {pipeline_mode = #tpu.pipeline_mode<synchronous>, transform_indices = @transform_3, window_bounds = array<i64: 256, 256>}, {pipeline_mode = #tpu.pipeline_mode<synchronous>, transform_indices = @transform_4, window_bounds = array<i64: 1, 256>}, {pipeline_mode = #tpu.pipeline_mode<synchronous>, transform_indices = @transform_5, window_bounds = array<i64: 256, 256>}, {pipeline_mode = #tpu.pipeline_mode<synchronous>, transform_indices = @transform_6, window_bounds = array<i64: 1, 256>}, {pipeline_mode = #tpu.pipeline_mode<synchronous>, transform_indices = @transform_7, window_bounds = array<i64: 256, 256>}, {pipeline_mode = #tpu.pipeline_mode<synchronous>, transform_indices = @transform_8, window_bounds = array<i64: 1, 256>}, {transform_indices = @transform_9, window_bounds = array<i64: 2, 16, 256>}]} {
    %c0 = arith.constant 0 : index
    %c0_0 = arith.constant 0 : index
    %c0_1 = arith.constant 0 : index
    %0 = vector.load %arg1[%c0, %c0_0, %c0_1] : memref<2x16x256xbf16, #tpu.memory_space<vmem>>, vector<2x16x256xbf16>
    %1 = vector.shape_cast %0 : vector<2x16x256xbf16> to vector<32x256xbf16>
    %2 = vector.shape_cast %0 : vector<2x16x256xbf16> to vector<32x256xbf16>
    %c0_2 = arith.constant 0 : index
    %c0_3 = arith.constant 0 : index
    %3 = vector.load %arg2[%c0_2, %c0_3] : memref<256x256xbf16, #tpu.memory_space<vmem>>, vector<256x128xbf16>
    %cst = arith.constant dense<0.000000e+00> : vector<32x128xf32>
    %4 = tpu.matmul %1, %3, %cst {dimension_numbers = #tpu.dot_dimension_numbers<[1], [0], [0], [1], [0, 0, 1, 1], [], []>} : vector<32x256xbf16>, vector<256x128xbf16>, vector<32x128xf32> -> vector<32x128xf32>
    %c0_4 = arith.constant 0 : index
    %c0_5 = arith.constant 0 : index
    %5 = vector.load %arg3[%c0_4, %c0_5] : memref<1x256xf32, #tpu.memory_space<vmem>>, vector<1x128xf32>
    %6 = vector.broadcast %5 : vector<1x128xf32> to vector<32x128xf32>
    %7 = arith.addf %4, %6 : vector<32x128xf32>
    %8 = vector.shape_cast %7 : vector<32x128xf32> to vector<2x16x128xf32>
    %9 = arith.truncf %8 : vector<2x16x128xf32> to vector<2x16x128xbf16>
    %c0_6 = arith.constant 0 : index
    %c0_7 = arith.constant 0 : index
    %10 = vector.load %arg4[%c0_6, %c0_7] : memref<256x256xbf16, #tpu.memory_space<vmem>>, vector<256x128xbf16>
    %cst_8 = arith.constant dense<0.000000e+00> : vector<32x128xf32>
    %11 = tpu.matmul %2, %10, %cst_8 {dimension_numbers = #tpu.dot_dimension_numbers<[1], [0], [0], [1], [0, 0, 1, 1], [], []>} : vector<32x256xbf16>, vector<256x128xbf16>, vector<32x128xf32> -> vector<32x128xf32>
    %c0_9 = arith.constant 0 : index
    %c0_10 = arith.constant 0 : index
    %12 = vector.load %arg5[%c0_9, %c0_10] : memref<1x256xf32, #tpu.memory_space<vmem>>, vector<1x128xf32>
    %13 = vector.broadcast %12 : vector<1x128xf32> to vector<32x128xf32>
    %14 = arith.addf %11, %13 : vector<32x128xf32>
    %15 = vector.shape_cast %14 : vector<32x128xf32> to vector<2x16x128xf32>
    %16 = arith.truncf %15 : vector<2x16x128xf32> to vector<2x16x128xbf16>
    %c0_11 = arith.constant 0 : index
    %c0_12 = arith.constant 0 : index
    %17 = vector.load %arg6[%c0_11, %c0_12] : memref<256x256xbf16, #tpu.memory_space<vmem>>, vector<256x128xbf16>
    %cst_13 = arith.constant dense<0.000000e+00> : vector<32x128xf32>
    %18 = tpu.matmul %2, %17, %cst_13 {dimension_numbers = #tpu.dot_dimension_numbers<[1], [0], [0], [1], [0, 0, 1, 1], [], []>} : vector<32x256xbf16>, vector<256x128xbf16>, vector<32x128xf32> -> vector<32x128xf32>
    %c0_14 = arith.constant 0 : index
    %c0_15 = arith.constant 0 : index
    %19 = vector.load %arg7[%c0_14, %c0_15] : memref<1x256xf32, #tpu.memory_space<vmem>>, vector<1x128xf32>
    %20 = vector.broadcast %19 : vector<1x128xf32> to vector<32x128xf32>
    %21 = arith.addf %18, %20 : vector<32x128xf32>
    %22 = vector.shape_cast %21 : vector<32x128xf32> to vector<2x16x128xf32>
    %23 = arith.truncf %22 : vector<2x16x128xf32> to vector<2x16x128xbf16>
    "tpu.trace_start"() <{level = 10 : i32, message = "bqd,bkd->bqk"}> : () -> ()
    %cst_16 = arith.constant dense<0.000000e+00> : vector<2x16x16xf32>
    %24 = tpu.matmul %9, %16, %cst_16 {dimension_numbers = #tpu.dot_dimension_numbers<[2], [2], [1], [1], [0, 0, 0, 1, 1, 1], [0], [0]>} : vector<2x16x128xbf16>, vector<2x16x128xbf16>, vector<2x16x16xf32> -> vector<2x16x16xf32>
    "tpu.trace_stop"() : () -> ()
    %cst_17 = arith.constant dense<0xFF800000> : vector<2x16xf32>
    %25 = vector.multi_reduction <maximumf>, %24, %cst_17 [2] : vector<2x16x16xf32> to vector<2x16xf32>
    %26 = vector.shape_cast %25 : vector<2x16xf32> to vector<2x16x1xf32>
    %27 = vector.broadcast %26 : vector<2x16x1xf32> to vector<2x16x16xf32>
    %28 = arith.subf %24, %27 : vector<2x16x16xf32>
    %29 = math.exp %28 : vector<2x16x16xf32>
    %cst_18 = arith.constant dense<0.000000e+00> : vector<2x16xf32>
    %30 = vector.multi_reduction <add>, %29, %cst_18 [2] : vector<2x16x16xf32> to vector<2x16xf32>
    %31 = vector.shape_cast %30 : vector<2x16xf32> to vector<2x16x1xf32>
    %32 = tpu.reciprocal %31 {approx = true} : vector<2x16x1xf32> -> vector<2x16x1xf32>
    %33 = vector.broadcast %32 : vector<2x16x1xf32> to vector<2x16x16xf32>
    %34 = arith.mulf %29, %33 : vector<2x16x16xf32>
    %35 = arith.truncf %34 : vector<2x16x16xf32> to vector<2x16x16xbf16>
    "tpu.trace_start"() <{level = 10 : i32, message = "bqk,bkd->bqd"}> : () -> ()
    %cst_19 = arith.constant dense<0.000000e+00> : vector<2x16x128xf32>
    %36 = tpu.matmul %35, %23, %cst_19 {dimension_numbers = #tpu.dot_dimension_numbers<[2], [1], [1], [2], [0, 0, 0, 1, 1, 2], [0], [0]>} : vector<2x16x16xbf16>, vector<2x16x128xbf16>, vector<2x16x128xf32> -> vector<2x16x128xf32>
    "tpu.trace_stop"() : () -> ()
    %37 = vector.shape_cast %36 : vector<2x16x128xf32> to vector<32x128xf32>
    %38 = arith.truncf %37 : vector<32x128xf32> to vector<32x128xbf16>
    %c0_20 = arith.constant 0 : index
    %c0_21 = arith.constant 0 : index
    %39 = vector.load %arg11[%c0_20, %c0_21] : memref<32x256xbf16, #tpu.memory_space<vmem>>, vector<32x128xbf16>
    tpu.vector_store %arg11[%c0_20, %c0_21], %38 {strides = array<i32>} : memref<32x256xbf16, #tpu.memory_space<vmem>>, vector<32x128xbf16>,
    %c0_22 = arith.constant 0 : index
    %c128 = arith.constant 128 : index
    %40 = vector.load %arg2[%c0_22, %c128] : memref<256x256xbf16, #tpu.memory_space<vmem>>, vector<256x128xbf16>
    %cst_23 = arith.constant dense<0.000000e+00> : vector<32x128xf32>
    %41 = tpu.matmul %1, %40, %cst_23 {dimension_numbers = #tpu.dot_dimension_numbers<[1], [0], [0], [1], [0, 0, 1, 1], [], []>} : vector<32x256xbf16>, vector<256x128xbf16>, vector<32x128xf32> -> vector<32x128xf32>
    %c0_24 = arith.constant 0 : index
    %c128_25 = arith.constant 128 : index
    %42 = vector.load %arg3[%c0_24, %c128_25] : memref<1x256xf32, #tpu.memory_space<vmem>>, vector<1x128xf32>
    %43 = vector.broadcast %42 : vector<1x128xf32> to vector<32x128xf32>
    %44 = arith.addf %41, %43 : vector<32x128xf32>
    %45 = vector.shape_cast %44 : vector<32x128xf32> to vector<2x16x128xf32>
    %46 = arith.truncf %45 : vector<2x16x128xf32> to vector<2x16x128xbf16>
    %c0_26 = arith.constant 0 : index
    %c128_27 = arith.constant 128 : index
    %47 = vector.load %arg4[%c0_26, %c128_27] : memref<256x256xbf16, #tpu.memory_space<vmem>>, vector<256x128xbf16>
    %cst_28 = arith.constant dense<0.000000e+00> : vector<32x128xf32>
    %48 = tpu.matmul %2, %47, %cst_28 {dimension_numbers = #tpu.dot_dimension_numbers<[1], [0], [0], [1], [0, 0, 1, 1], [], []>} : vector<32x256xbf16>, vector<256x128xbf16>, vector<32x128xf32> -> vector<32x128xf32>
    %c0_29 = arith.constant 0 : index
    %c128_30 = arith.constant 128 : index
    %49 = vector.load %arg5[%c0_29, %c128_30] : memref<1x256xf32, #tpu.memory_space<vmem>>, vector<1x128xf32>
    %50 = vector.broadcast %49 : vector<1x128xf32> to vector<32x128xf32>
    %51 = arith.addf %48, %50 : vector<32x128xf32>
    %52 = vector.shape_cast %51 : vector<32x128xf32> to vector<2x16x128xf32>
    %53 = arith.truncf %52 : vector<2x16x128xf32> to vector<2x16x128xbf16>
    %c0_31 = arith.constant 0 : index
    %c128_32 = arith.constant 128 : index
    %54 = vector.load %arg6[%c0_31, %c128_32] : memref<256x256xbf16, #tpu.memory_space<vmem>>, vector<256x128xbf16>
    %cst_33 = arith.constant dense<0.000000e+00> : vector<32x128xf32>
    %55 = tpu.matmul %2, %54, %cst_33 {dimension_numbers = #tpu.dot_dimension_numbers<[1], [0], [0], [1], [0, 0, 1, 1], [], []>} : vector<32x256xbf16>, vector<256x128xbf16>, vector<32x128xf32> -> vector<32x128xf32>
    %c0_34 = arith.constant 0 : index
    %c128_35 = arith.constant 128 : index
    %56 = vector.load %arg7[%c0_34, %c128_35] : memref<1x256xf32, #tpu.memory_space<vmem>>, vector<1x128xf32>
    %57 = vector.broadcast %56 : vector<1x128xf32> to vector<32x128xf32>
    %58 = arith.addf %55, %57 : vector<32x128xf32>
    %59 = vector.shape_cast %58 : vector<32x128xf32> to vector<2x16x128xf32>
    %60 = arith.truncf %59 : vector<2x16x128xf32> to vector<2x16x128xbf16>
    "tpu.trace_start"() <{level = 10 : i32, message = "bqd,bkd->bqk"}> : () -> ()
    %cst_36 = arith.constant dense<0.000000e+00> : vector<2x16x16xf32>
    %61 = tpu.matmul %46, %53, %cst_36 {dimension_numbers = #tpu.dot_dimension_numbers<[2], [2], [1], [1], [0, 0, 0, 1, 1, 1], [0], [0]>} : vector<2x16x128xbf16>, vector<2x16x128xbf16>, vector<2x16x16xf32> -> vector<2x16x16xf32>
    "tpu.trace_stop"() : () -> ()
    %cst_37 = arith.constant dense<0xFF800000> : vector<2x16xf32>
    %62 = vector.multi_reduction <maximumf>, %61, %cst_37 [2] : vector<2x16x16xf32> to vector<2x16xf32>
    %63 = vector.shape_cast %62 : vector<2x16xf32> to vector<2x16x1xf32>
    %64 = vector.broadcast %63 : vector<2x16x1xf32> to vector<2x16x16xf32>
    %65 = arith.subf %61, %64 : vector<2x16x16xf32>
    %66 = math.exp %65 : vector<2x16x16xf32>
    %cst_38 = arith.constant dense<0.000000e+00> : vector<2x16xf32>
    %67 = vector.multi_reduction <add>, %66, %cst_38 [2] : vector<2x16x16xf32> to vector<2x16xf32>
    %68 = vector.shape_cast %67 : vector<2x16xf32> to vector<2x16x1xf32>
    %69 = tpu.reciprocal %68 {approx = true} : vector<2x16x1xf32> -> vector<2x16x1xf32>
    %70 = vector.broadcast %69 : vector<2x16x1xf32> to vector<2x16x16xf32>
    %71 = arith.mulf %66, %70 : vector<2x16x16xf32>
    %72 = arith.truncf %71 : vector<2x16x16xf32> to vector<2x16x16xbf16>
    "tpu.trace_start"() <{level = 10 : i32, message = "bqk,bkd->bqd"}> : () -> ()
    %cst_39 = arith.constant dense<0.000000e+00> : vector<2x16x128xf32>
    %73 = tpu.matmul %72, %60, %cst_39 {dimension_numbers = #tpu.dot_dimension_numbers<[2], [1], [1], [2], [0, 0, 0, 1, 1, 2], [0], [0]>} : vector<2x16x16xbf16>, vector<2x16x128xbf16>, vector<2x16x128xf32> -> vector<2x16x128xf32>
    "tpu.trace_stop"() : () -> ()
    %74 = vector.shape_cast %73 : vector<2x16x128xf32> to vector<32x128xf32>
    %75 = arith.truncf %74 : vector<32x128xf32> to vector<32x128xbf16>
    %c0_40 = arith.constant 0 : index
    %c128_41 = arith.constant 128 : index
    %76 = vector.load %arg11[%c0_40, %c128_41] : memref<32x256xbf16, #tpu.memory_space<vmem>>, vector<32x128xbf16>
    tpu.vector_store %arg11[%c0_40, %c128_41], %75 {strides = array<i32>} : memref<32x256xbf16, #tpu.memory_space<vmem>>, vector<32x128xbf16>,
    %c0_42 = arith.constant 0 : index
    %c0_43 = arith.constant 0 : index
    %77 = vector.load %arg11[%c0_42, %c0_43] : memref<32x256xbf16, #tpu.memory_space<vmem>>, vector<32x256xbf16>
    %c0_44 = arith.constant 0 : index
    %c0_45 = arith.constant 0 : index
    %78 = vector.load %arg8[%c0_44, %c0_45] : memref<256x256xbf16, #tpu.memory_space<vmem>>, vector<256x256xbf16>
    %cst_46 = arith.constant dense<0.000000e+00> : vector<32x256xf32>
    %79 = tpu.matmul %77, %78, %cst_46 {dimension_numbers = #tpu.dot_dimension_numbers<[1], [0], [0], [1], [0, 0, 1, 1], [], []>} : vector<32x256xbf16>, vector<256x256xbf16>, vector<32x256xf32> -> vector<32x256xf32>
    %c0_47 = arith.constant 0 : index
    %c0_48 = arith.constant 0 : index
    %80 = vector.load %arg9[%c0_47, %c0_48] : memref<1x256xf32, #tpu.memory_space<vmem>>, vector<1x256xf32>
    %81 = vector.broadcast %80 : vector<1x256xf32> to vector<32x256xf32>
    %82 = arith.addf %79, %81 : vector<32x256xf32>
    %83 = vector.shape_cast %82 : vector<32x256xf32> to vector<2x16x256xf32>
    %c0_49 = arith.constant 0 : index
    %c0_50 = arith.constant 0 : index
    %c0_51 = arith.constant 0 : index
    %84 = vector.load %arg10[%c0_49, %c0_50, %c0_51] : memref<2x16x256xf32, #tpu.memory_space<vmem>>, vector<2x16x256xf32>
    tpu.vector_store %arg10[%c0_49, %c0_50, %c0_51], %83 {strides = array<i32>} : memref<2x16x256xf32, #tpu.memory_space<vmem>>, vector<2x16x256xf32>,
    return
  }
  func.func @transform_0(%arg0: i32) -> (i32, i32, i32) {
    %c0_i32 = arith.constant 0 : i32
    %c0_i32_0 = arith.constant 0 : i32
    %c0_i32_1 = arith.constant 0 : i32
    return %arg0, %c0_i32, %c0_i32_0 : i32, i32, i32
  }
  func.func @transform_1(%arg0: i32) -> (i32, i32) {
    %c0_i32 = arith.constant 0 : i32
    %c0_i32_0 = arith.constant 0 : i32
    %c0_i32_1 = arith.constant 0 : i32
    return %c0_i32, %c0_i32_0 : i32, i32
  }
  func.func @transform_2(%arg0: i32) -> (i32, i32) {
    %c0_i32 = arith.constant 0 : i32
    %c0_i32_0 = arith.constant 0 : i32
    %c0_i32_1 = arith.constant 0 : i32
    return %c0_i32, %c0_i32_0 : i32, i32
  }
  func.func @transform_3(%arg0: i32) -> (i32, i32) {
    %c0_i32 = arith.constant 0 : i32
    %c0_i32_0 = arith.constant 0 : i32
    %c0_i32_1 = arith.constant 0 : i32
    return %c0_i32, %c0_i32_0 : i32, i32
  }
  func.func @transform_4(%arg0: i32) -> (i32, i32) {
    %c0_i32 = arith.constant 0 : i32
    %c0_i32_0 = arith.constant 0 : i32
    %c0_i32_1 = arith.constant 0 : i32
    return %c0_i32, %c0_i32_0 : i32, i32
  }
  func.func @transform_5(%arg0: i32) -> (i32, i32) {
    %c0_i32 = arith.constant 0 : i32
    %c0_i32_0 = arith.constant 0 : i32
    %c0_i32_1 = arith.constant 0 : i32
    return %c0_i32, %c0_i32_0 : i32, i32
  }
  func.func @transform_6(%arg0: i32) -> (i32, i32) {
    %c0_i32 = arith.constant 0 : i32
    %c0_i32_0 = arith.constant 0 : i32
    %c0_i32_1 = arith.constant 0 : i32
    return %c0_i32, %c0_i32_0 : i32, i32
  }
  func.func @transform_7(%arg0: i32) -> (i32, i32) {
    %c0_i32 = arith.constant 0 : i32
    %c0_i32_0 = arith.constant 0 : i32
    %c0_i32_1 = arith.constant 0 : i32
    return %c0_i32, %c0_i32_0 : i32, i32
  }
  func.func @transform_8(%arg0: i32) -> (i32, i32) {
    %c0_i32 = arith.constant 0 : i32
    %c0_i32_0 = arith.constant 0 : i32
    %c0_i32_1 = arith.constant 0 : i32
    return %c0_i32, %c0_i32_0 : i32, i32
  }
  func.func @transform_9(%arg0: i32) -> (i32, i32, i32) {
    %c0_i32 = arith.constant 0 : i32
    %c0_i32_0 = arith.constant 0 : i32
    %c0_i32_1 = arith.constant 0 : i32
    return %arg0, %c0_i32, %c0_i32_0 : i32, i32, i32
  }
}

</mosaic_0001>

<bundles_post_ra>
// kernel: tpu_custom_call.1
= control target key start
LH: loop header
LB: loop body
LE: loop exit
PB: predicated region body
PF: predicated region fallthrough
CT: control target
= control target key end

     0   :  { %14 = vsyncpa [#allocation4], 0  ;;  %s3148_s0 = inlined_call_operand.hbm [shape: bf16[2,16,256], index: 0, kind: input, shape index: {}]   ;;  %s3149_s1 = inlined_call_operand.hbm [shape: bf16[256,256], index: 1, kind: input, shape index: {}]   ;;  %s3150_s2 = inlined_call_operand.hbm [shape: f32[1,256], index: 2, kind: input, shape index: {}]   ;;  %s3151_s3 = inlined_call_operand.hbm [shape: bf16[256,256], index: 3, kind: input, shape index: {}]   ;;  %s3152_s4 = inlined_call_operand.hbm [shape: f32[1,256], index: 4, kind: input, shape index: {}]   ;;  %s3153_s5 = inlined_call_operand.hbm [shape: bf16[256,256], index: 5, kind: input, shape index: {}]   ;;  %s3154_s6 = inlined_call_operand.hbm [shape: f32[1,256], index: 6, kind: input, shape index: {}]   ;;  %s3155_s7 = inlined_call_operand.hbm [shape: bf16[256,256], index: 7, kind: input, shape index: {}]   ;;  %s3156_s8 = inlined_call_operand.hbm [shape: f32[1,256], index: 8, kind: input, shape index: {}]   ;;  %s3157_s9 = inlined_call_operand.hbm [shape: f32[2,16,256], index: 9, kind: output, shape index: {}]  }
   0x1   :  { %15 = vsyncpa [#allocation7], 0 }
   0x2   :  { %16 = vsyncpa [#allocation10], 0 }
   0x3   :  { %17 = vsyncpa [#allocation13], 0 }
   0x4   :  { %18 = vsyncpa [#allocation16], 0 }
   0x5   :  { %19 = vsyncpa [#allocation5], 0  ;;  %s2826_s30 = smov [#allocation6]   ;;  %s2827_s11 = smov [#allocation9]  }
   0x6   :  { %s37_s10 = sshll.u32 %s2826_s30, 4  ;;  %s59_s12 = sshll.u32 %s2827_s11, 4  ;;  %s38_s10 = int_to_ptr.vmem [resolvable:$true] %s37_s10  ;;  %s2892_s12 = int_to_ptr.vmem [resolvable:$true] %s59_s12 }
   0x7   :  { %s2594_s15 = scalar_lea.hbm %s3149_s1, 4096 }
   0x8   :  { %p2595_p0 = scmp.ne.s32.totalorder %s3149_s1, %s2594_s15  ;;  %p2598_p1 = scmp.lt.u32.totalorder %s2594_s15, %s3149_s1 }
   0xa   :  { %p2600_p2 = pnand %p2598_p1, %p2595_p0 }
   0xc   :  { %2603 = shalt.err (!%p2600_p2)
}
   0xd   :  { %s2604_s20 = scalar_lea.vmem %s38_s10, 4096  ;;  %p2609_p4 = scmp.lt.s32.totalorder %s38_s10, %s38_s10 }
   0xe   :  { %p2605_p3 = scmp.ne.s32.totalorder %s38_s10, %s2604_s20  ;;  %p2610_p5 = scmp.lt.s32.totalorder %s2604_s20, %s2604_s20 }
  0x10   :  { %p2611_p6 = por %p2610_p5, %p2609_p4 }
  0x12   :  { %p2612_p7 = pnand %p2611_p6, %p2605_p3 }
  0x14   :  { %2615 = shalt.err (!%p2612_p7)
}
  0x15   :  { %s2828_s21 = smov 128   ;;  %s2829_s22 = smov 8  }
  0x16   :  { %43 = dma.hbm_to_vmem [thread:$0]  %s3149_s1, 4096, %s38_s10, [#allocation7], %s2828_s21, %s2828_s21, %s2829_s22  }
  0x17   :  { %s2616_s27 = scalar_lea.hbm %s3151_s3, 4096 }
  0x18   :  { %p2617_p8 = scmp.ne.s32.totalorder %s3151_s3, %s2616_s27  ;;  %p2620_p9 = scmp.lt.u32.totalorder %s2616_s27, %s3151_s3 }
  0x1a   :  { %p2622_p10 = pnand %p2620_p9, %p2617_p8 }
  0x1c   :  { %2625 = shalt.err (!%p2622_p10)
}
  0x1d   :  { %s2626_s13 = scalar_lea.vmem %s2892_s12, 4096  ;;  %p2631_p12 = scmp.lt.s32.totalorder %s2892_s12, %s2892_s12 }
  0x1e   :  { %p2627_p11 = scmp.ne.s32.totalorder %s2892_s12, %s2626_s13  ;;  %p2632_p13 = scmp.lt.s32.totalorder %s2626_s13, %s2626_s13 }
  0x20   :  { %p2633_p0 = por %p2632_p13, %p2631_p12 }
  0x22   :  { %p2634_p1 = pnand %p2633_p0, %p2627_p11 }
  0x24   :  { %2637 = shalt.err (!%p2634_p1)
}
  0x25   :  { %65 = dma.hbm_to_vmem [thread:$0]  %s3151_s3, 4096, %s2892_s12, [#allocation10], %s2828_s21, %s2828_s21, %s2829_s22  }
  0x26   :  { %s2830_s14 = smov [#allocation12]   ;;  %s2831_s16 = smov [#allocation15]  }
  0x27   :  { %s81_s15 = sshll.u32 %s2830_s14, 4  ;;  %s103_s17 = sshll.u32 %s2831_s16, 4  ;;  %s82_s15 = int_to_ptr.vmem [resolvable:$true] %s81_s15  ;;  %s2929_s17 = int_to_ptr.vmem [resolvable:$true] %s103_s17 }
  0x28   :  { %s2638_s20 = scalar_lea.hbm %s3153_s5, 4096 }
  0x29   :  { %p2639_p2 = scmp.ne.s32.totalorder %s3153_s5, %s2638_s20  ;;  %p2642_p3 = scmp.lt.u32.totalorder %s2638_s20, %s3153_s5 }
  0x2b   :  { %p2644_p4 = pnand %p2642_p3, %p2639_p2 }
  0x2d   :  { %2647 = shalt.err (!%p2644_p4)
}
  0x2e   :  { %s2648_s3 = scalar_lea.vmem %s82_s15, 4096  ;;  %p2653_p6 = scmp.lt.s32.totalorder %s82_s15, %s82_s15 }
  0x2f   :  { %p2649_p5 = scmp.ne.s32.totalorder %s82_s15, %s2648_s3  ;;  %p2654_p7 = scmp.lt.s32.totalorder %s2648_s3, %s2648_s3 }
  0x31   :  { %p2655_p8 = por %p2654_p7, %p2653_p6 }
  0x33   :  { %p2656_p9 = pnand %p2655_p8, %p2649_p5 }
  0x35   :  { %2659 = shalt.err (!%p2656_p9)
}
  0x36   :  { %87 = dma.hbm_to_vmem [thread:$0]  %s3153_s5, 4096, %s82_s15, [#allocation13], %s2828_s21, %s2828_s21, %s2829_s22  }
  0x37   :  { %s2660_s30 = scalar_lea.hbm %s3155_s7, 4096 }
  0x38   :  { %p2661_p10 = scmp.ne.s32.totalorder %s3155_s7, %s2660_s30  ;;  %p2664_p11 = scmp.lt.u32.totalorder %s2660_s30, %s3155_s7 }
  0x3a   :  { %p2666_p12 = pnand %p2664_p11, %p2661_p10 }
  0x3c   :  { %2669 = shalt.err (!%p2666_p12)
}
  0x3d   :  { %s2670_s14 = scalar_lea.vmem %s2929_s17, 4096  ;;  %p2675_p0 = scmp.lt.s32.totalorder %s2929_s17, %s2929_s17 }
  0x3e   :  { %p2671_p13 = scmp.ne.s32.totalorder %s2929_s17, %s2670_s14  ;;  %p2676_p1 = scmp.lt.s32.totalorder %s2670_s14, %s2670_s14 }
  0x40   :  { %p2677_p2 = por %p2676_p1, %p2675_p0 }
  0x42   :  { %p2678_p3 = pnand %p2677_p2, %p2671_p13 }
  0x44   :  { %2681 = shalt.err (!%p2678_p3)
}
  0x45   :  { %109 = dma.hbm_to_vmem [thread:$0]  %s3155_s7, 4096, %s2929_s17, [#allocation16], %s2828_s21, %s2828_s21, %s2829_s22  }
  0x46   :  { %s2832_s16 = smov [#allocation3]   ;;  %s2833_s19 = smov [#allocation8]  }
  0x47   :  { %s25_s18 = sshll.u32 %s2832_s16, 4  ;;  %s50_s20 = sshll.u32 %s2833_s19, 4  ;;  %s26_s18 = int_to_ptr.vmem [resolvable:$true] %s25_s18  ;;  %s51_s20 = int_to_ptr.vmem [resolvable:$true] %s50_s20 }
  0x48   :  { %s2682_s25 = scalar_lea.hbm %s3148_s0, 512 }
  0x49   :  { %p2683_p4 = scmp.ne.s32.totalorder %s3148_s0, %s2682_s25  ;;  %p2686_p5 = scmp.lt.u32.totalorder %s2682_s25, %s3148_s0 }
  0x4b   :  { %p2688_p6 = pnand %p2686_p5, %p2683_p4 }
  0x4d   :  { %2691 = shalt.err (!%p2688_p6)
}
  0x4e   :  { %s2692_s7 = scalar_lea.vmem %s26_s18, 512  ;;  %p2697_p8 = scmp.lt.s32.totalorder %s26_s18, %s26_s18 }
  0x4f   :  { %p2693_p7 = scmp.ne.s32.totalorder %s26_s18, %s2692_s7  ;;  %p2698_p9 = scmp.lt.s32.totalorder %s2692_s7, %s2692_s7 }
  0x51   :  { %p2699_p10 = por %p2698_p9, %p2697_p8 }
  0x53   :  { %p2700_p11 = pnand %p2699_p10, %p2693_p7 }
  0x55   :  { %2703 = shalt.err (!%p2700_p11)
}
  0x56   :  { %31 = dma.hbm_to_vmem [thread:$0]  %s3148_s0, 512, %s26_s18, [#allocation4], %s2828_s21, %s2828_s21, %s2829_s22  }
  0x57   :  { %s2704_s11 = scalar_lea.hbm %s3150_s2, 32 }
  0x58   :  { %p2705_p12 = scmp.ne.s32.totalorder %s3150_s2, %s2704_s11  ;;  %p2708_p13 = scmp.lt.u32.totalorder %s2704_s11, %s3150_s2 }
  0x5a   :  { %p2710_p0 = pnand %p2708_p13, %p2705_p12 }
  0x5c   :  { %2713 = shalt.err (!%p2710_p0)
}
  0x5d   :  { %s2714_s5 = scalar_lea.vmem %s51_s20, 32  ;;  %p2719_p2 = scmp.lt.s32.totalorder %s51_s20, %s51_s20 }
  0x5e   :  { %p2715_p1 = scmp.ne.s32.totalorder %s51_s20, %s2714_s5  ;;  %p2720_p3 = scmp.lt.s32.totalorder %s2714_s5, %s2714_s5 }
  0x60   :  { %p2721_p4 = por %p2720_p3, %p2719_p2 }
  0x62   :  { %p2722_p5 = pnand %p2721_p4, %p2715_p1 }
  0x64   :  { %2725 = shalt.err (!%p2722_p5)
}
  0x65   :  { %53 = dma.hbm_to_vmem [thread:$0]  %s3150_s2, 32, %s51_s20, [#allocation7]  }
  0x66   :  { %s2834_s22 = smov [#allocation11]   ;;  %s2835_s16 = smov [#allocation14]  }
  0x67   :  { %s72_s15 = sshll.u32 %s2834_s22, 4  ;;  %s94_s18 = sshll.u32 %s2835_s16, 4  ;;  %s73_s15 = int_to_ptr.vmem [resolvable:$true] %s72_s15  ;;  %s95_s18 = int_to_ptr.vmem [resolvable:$true] %s94_s18 }
  0x68   :  { %s2726_s24 = scalar_lea.hbm %s3152_s4, 32 }
  0x69   :  { %p2727_p6 = scmp.ne.s32.totalorder %s3152_s4, %s2726_s24  ;;  %p2730_p7 = scmp.lt.u32.totalorder %s2726_s24, %s3152_s4 }
  0x6b   :  { %p2732_p8 = pnand %p2730_p7, %p2727_p6 }
  0x6d   :  { %2735 = shalt.err (!%p2732_p8)
}
  0x6e   :  { %s2736_s2 = scalar_lea.vmem %s73_s15, 32  ;;  %p2741_p10 = scmp.lt.s32.totalorder %s73_s15, %s73_s15 }
  0x6f   :  { %p2737_p9 = scmp.ne.s32.totalorder %s73_s15, %s2736_s2  ;;  %p2742_p11 = scmp.lt.s32.totalorder %s2736_s2, %s2736_s2 }
  0x71   :  { %p2743_p12 = por %p2742_p11, %p2741_p10 }
  0x73   :  { %p2744_p13 = pnand %p2743_p12, %p2737_p9 }
  0x75   :  { %2747 = shalt.err (!%p2744_p13)
}
  0x76   :  { %75 = dma.hbm_to_vmem [thread:$0]  %s3152_s4, 32, %s73_s15, [#allocation10]  }
  0x77   :  { %s2748_s28 = scalar_lea.hbm %s3154_s6, 32 }
  0x78   :  { %p2749_p0 = scmp.ne.s32.totalorder %s3154_s6, %s2748_s28  ;;  %p2752_p1 = scmp.lt.u32.totalorder %s2748_s28, %s3154_s6 }
  0x7a   :  { %p2754_p2 = pnand %p2752_p1, %p2749_p0 }
  0x7c   :  { %2757 = shalt.err (!%p2754_p2)
}
  0x7d   :  { %s2758_s1 = scalar_lea.vmem %s95_s18, 32  ;;  %p2763_p4 = scmp.lt.s32.totalorder %s95_s18, %s95_s18 }
  0x7e   :  { %p2759_p3 = scmp.ne.s32.totalorder %s95_s18, %s2758_s1  ;;  %p2764_p5 = scmp.lt.s32.totalorder %s2758_s1, %s2758_s1 }
  0x80   :  { %p2765_p6 = por %p2764_p5, %p2763_p4 }
  0x82   :  { %p2766_p7 = pnand %p2765_p6, %p2759_p3 }
  0x84   :  { %2769 = shalt.err (!%p2766_p7)
}
  0x85   :  { %97 = dma.hbm_to_vmem [thread:$0]  %s3154_s6, 32, %s95_s18, [#allocation13]  }
  0x86   :  { %s2836_s14 = smov [#allocation17]   ;;  %s2770_s22 = scalar_lea.hbm %s3156_s8, 32 }
  0x87   :  { %s116_s5 = sshll.u32 %s2836_s14, 4  ;;  %p2771_p8 = scmp.ne.s32.totalorder %s3156_s8, %s2770_s22  ;;  %s117_s5 = int_to_ptr.vmem [resolvable:$true] %s116_s5 }
  0x88   :  { %p2774_p9 = scmp.lt.u32.totalorder %s2770_s22, %s3156_s8 }
  0x8a   :  { %p2776_p10 = pnand %p2774_p9, %p2771_p8 }
  0x8c   :  { %2779 = shalt.err (!%p2776_p10)
}
  0x8d   :  { %s2780_s24 = scalar_lea.vmem %s117_s5, 32  ;;  %p2785_p12 = scmp.lt.s32.totalorder %s117_s5, %s117_s5 }
  0x8e   :  { %p2781_p11 = scmp.ne.s32.totalorder %s117_s5, %s2780_s24  ;;  %p2786_p13 = scmp.lt.s32.totalorder %s2780_s24, %s2780_s24 }
  0x90   :  { %p2787_p0 = por %p2786_p13, %p2785_p12 }
  0x92   :  { %p2788_p1 = pnand %p2787_p0, %p2781_p11 }
  0x94   :  { %2791 = shalt.err (!%p2788_p1)
}
  0x95   :  { %119 = dma.hbm_to_vmem [thread:$0]  %s3156_s8, 32, %s117_s5, [#allocation16]  }
  0x96   :  { %2814 = dma.done.wait [#allocation4], 512  }
  0x97   :  { %2815 = vsyncadd [#allocation4], 4294966784 }
  0x98   :  { %2816 = dma.done.wait [#allocation7], 4128  }
  0x99   :  { %2817 = vsyncadd [#allocation7], 4294963168 }
  0x9a   :  { %2818 = dma.done.wait [#allocation10], 4128  }
  0x9b   :  { %2819 = vsyncadd [#allocation10], 4294963168 }
  0x9c   :  { %2820 = dma.done.wait [#allocation13], 4128  }
  0x9d   :  { %2821 = vsyncadd [#allocation13], 4294963168 }
  0x9e   :  { %2822 = dma.done.wait [#allocation16], 4128  }
  0x9f   :  { %2823 = vsyncadd [#allocation16], 4294963168  ;;  %v2409_v0 = vld [vmem:[#allocation6 + $0x80] ss:$8 sps:$4 sm:$0xff]   ;;  %v2411_v2 = vld [vmem:[#allocation6 + $0x90] ss:$8 sps:$4 sm:$0xff]  }
  0xa0   :  { %v2410_v1 = vld [vmem:[#allocation6] ss:$8 sps:$4 sm:$0xff]   ;;  %2161 = vmatprep.subr.bf16.mxu0 %v2409_v0  ;;  %v2412_v3 = vld [vmem:[#allocation6 + $0x10] ss:$8 sps:$4 sm:$0xff]   ;;  %v3029_v11 = vld [vmem:[#allocation3 + $0x4] ss:$8 sps:$4 sm:$0xff]  }
  0xa1   :  { %2162 = vmatpush3.bf16.msra.mxu0 %v2410_v1  ;;  %v2413_v4 = vld [vmem:[#allocation6 + $0xa0] ss:$8 sps:$4 sm:$0xff]   ;;  %v2415_v6 = vld [vmem:[#allocation6 + $0xb0] ss:$8 sps:$4 sm:$0xff]   ;;  %339 = vmatprep.mubr.bf16.mxu0 %v3029_v11  ;;  %v3034_v20 = vld [vmem:[#allocation3 + $0x14] ss:$8 sps:$4 sm:$0xff]  }
  0xa2   :  { %2163 = vmatprep.subr.bf16.mxu0 %v2411_v2  ;;  %v2414_v5 = vld [vmem:[#allocation6 + $0x20] ss:$8 sps:$4 sm:$0xff]   ;;  %v2416_v7 = vld [vmem:[#allocation6 + $0x30] ss:$8 sps:$4 sm:$0xff]   ;;  %v2837_v36 = vmov 0.0   ;;  %vm2838_vm0 = vmmov 0  }
  0xa3   :  { %v2417_v8 = vld [vmem:[#allocation6 + $0xc0] ss:$8 sps:$4 sm:$0xff]   ;;  %v2419_v10 = vld [vmem:[#allocation6 + $0xd0] ss:$8 sps:$4 sm:$0xff]   ;;  %2345 = vmatprep.subr.bf16.mxu1 %v2837_v36  ;;  %2347 = vmatprep.mubr.msk.bf16.mxu1 %vm2838_vm0, %v2837_v36  ;;  %vm812_vm1 = vcmask 130048   ;;  %s2839_s8 = smov [#allocation18]  }
  0xa4   :  { %v2418_v9 = vld [vmem:[#allocation6 + $0x40] ss:$8 sps:$4 sm:$0xff]   ;;  %v2420_v12 = vld [vmem:[#allocation6 + $0x50] ss:$8 sps:$4 sm:$0xff]   ;;  %s2003_s25 = sshll.u32 %s2839_s8, 4  ;;  %s2004_s25 = int_to_ptr.vmem [resolvable:$true] %s2003_s25 }
  0xa5   :  { %2164 = vmatpush3.bf16.msra.mxu0 %v2412_v3  ;;  %v2421_v13 = vld [vmem:[#allocation6 + $0xe0] ss:$8 sps:$4 sm:$0xff]   ;;  %v2423_v15 = vld [vmem:[#allocation6 + $0xf0] ss:$8 sps:$4 sm:$0xff]   ;;  %s2792_s26 = scalar_lea.vmem %s2004_s25, 1024  ;;  %p2797_p3 = scmp.lt.s32.totalorder %s2004_s25, %s2004_s25 }
  0xa6   :  { %2165 = vmatprep.subr.bf16.mxu0 %v2413_v4  ;;  %v2422_v14 = vld [vmem:[#allocation6 + $0x60] ss:$8 sps:$4 sm:$0xff]   ;;  %v2424_v16 = vld [vmem:[#allocation6 + $0x70] ss:$8 sps:$4 sm:$0xff]   ;;  %p2793_p2 = scmp.ne.s32.totalorder %s2004_s25, %s2792_s26  ;;  %p2798_p4 = scmp.lt.s32.totalorder %s2792_s26, %s2792_s26 }
  0xa7   :  { %v2428_v17 = vld [vmem:[#allocation9 + $0x80] ss:$8 sps:$4 sm:$0xff]   ;;  %v2430_v21 = vld [vmem:[#allocation9 + $0x90] ss:$8 sps:$4 sm:$0xff]   ;;  %v2019_v41 = vld [vmem:[#allocation8] ss:$0 sm:$0xff] }
  0xa8   :  { %v3032_v18 = vld [vmem:[#allocation3] ss:$8 sps:$4 sm:$0xff]   ;;  %v2431_v22 = vld [vmem:[#allocation9 + $0x10] ss:$8 sps:$4 sm:$0xff]   ;;  %p2799_p5 = por %p2798_p4, %p2797_p3 }
  0xa9   :  { %2166 = vmatpush3.bf16.msra.mxu0 %v2414_v5  ;;  %v2429_v19 = vld [vmem:[#allocation9] ss:$8 sps:$4 sm:$0xff]   ;;  %v3038_v24 = vld [vmem:[#allocation3 + $0x10] ss:$8 sps:$4 sm:$0xff]  }
  0xaa   :  { %2167 = vmatprep.subr.bf16.mxu0 %v2415_v6  ;;  %v2432_v23 = vld [vmem:[#allocation9 + $0xa0] ss:$8 sps:$4 sm:$0xff]   ;;  %v2434_v26 = vld [vmem:[#allocation9 + $0xb0] ss:$8 sps:$4 sm:$0xff]   ;;  %p2800_p6 = pnand %p2799_p5, %p2793_p2 }
  0xab   :  { %v2433_v25 = vld [vmem:[#allocation9 + $0x20] ss:$8 sps:$4 sm:$0xff]   ;;  %v2435_v27 = vld [vmem:[#allocation9 + $0x30] ss:$8 sps:$4 sm:$0xff]  }
  0xac   :  { %v2436_v28 = vld [vmem:[#allocation9 + $0xc0] ss:$8 sps:$4 sm:$0xff]   ;;  %v2440_v30 = vld [vmem:[#allocation9 + $0xd0] ss:$8 sps:$4 sm:$0xff]  }
  0xad   :  { %2168 = vmatpush3.bf16.msra.mxu0 %v2416_v7  ;;  %v2437_v29 = vld [vmem:[#allocation9 + $0x40] ss:$8 sps:$4 sm:$0xff]   ;;  %v2442_v31 = vld [vmem:[#allocation9 + $0x50] ss:$8 sps:$4 sm:$0xff]  }
  0xae   :  { %2169 = vmatprep.subr.bf16.mxu0 %v2417_v8  ;;  %v2443_v32 = vld [vmem:[#allocation9 + $0xe0] ss:$8 sps:$4 sm:$0xff]   ;;  %v2445_v34 = vld [vmem:[#allocation9 + $0xf0] ss:$8 sps:$4 sm:$0xff]  }
  0xaf   :  { %v2444_v33 = vld [vmem:[#allocation9 + $0x60] ss:$8 sps:$4 sm:$0xff]   ;;  %v2446_v35 = vld [vmem:[#allocation9 + $0x70] ss:$8 sps:$4 sm:$0xff]  }
  0xb0   :  { %v2040_v60 = vld [vmem:[#allocation11] ss:$0 sm:$0xff] }
  0xb1   :  { %2170 = vmatpush3.bf16.msra.mxu0 %v2418_v9 }
  0xb2   :  { %2171 = vmatprep.subr.bf16.mxu0 %v2419_v10 }
  0xb5   :  { %2172 = vmatpush3.bf16.msra.mxu0 %v2420_v12  ;;  %v2447_v12 = vld [vmem:[#allocation12 + $0x80] ss:$8 sps:$4 sm:$0xff]  }
  0xb6   :  { %2173 = vmatprep.subr.bf16.mxu0 %v2421_v13  ;;  %v2448_v13 = vld [vmem:[#allocation12] ss:$8 sps:$4 sm:$0xff]  }
  0xb9   :  { %2174 = vmatpush3.bf16.msra.mxu0 %v2422_v14  ;;  %v2449_v14 = vld [vmem:[#allocation12 + $0x90] ss:$8 sps:$4 sm:$0xff]  }
  0xba   :  { %2175 = vmatprep.subr.bf16.mxu0 %v2423_v15  ;;  %v2450_v15 = vld [vmem:[#allocation12 + $0x10] ss:$8 sps:$4 sm:$0xff]  }
  0xbd   :  { %2176 = vmatpush3.bf16.msra.mxu0 %v2424_v16  ;;  %v2451_v16 = vld [vmem:[#allocation12 + $0xa0] ss:$8 sps:$4 sm:$0xff]  }
  0xbe   :  { %2189 = vmatprep.subr.bf16.mxu0 %v2428_v17  ;;  %v2452_v17 = vld [vmem:[#allocation12 + $0x20] ss:$8 sps:$4 sm:$0xff]  }
  0xc0   :  { %340 = vmatmul.mubr.bf16.vlgmr.msra.gmra.mrb[0].mxu0 %v3032_v18 }
  0xc1   :  { %2190 = vmatpush3.bf16.msra.mxu0 %v2429_v19  ;;  %347 = vmatprep.mubr.bf16.mxu0 %v3034_v20  ;;  %v2453_v19 = vld [vmem:[#allocation12 + $0xb0] ss:$8 sps:$4 sm:$0xff]  }
  0xc2   :  { %2191 = vmatprep.subr.bf16.mxu0 %v2430_v21  ;;  %v2454_v21 = vld [vmem:[#allocation12 + $0x30] ss:$8 sps:$4 sm:$0xff]  }
  0xc5   :  { %2192 = vmatpush3.bf16.msra.mxu0 %v2431_v22  ;;  %v2455_v22 = vld [vmem:[#allocation12 + $0xc0] ss:$8 sps:$4 sm:$0xff]  }
  0xc6   :  { %2193 = vmatprep.subr.bf16.mxu0 %v2432_v23  ;;  %v2456_v23 = vld [vmem:[#allocation12 + $0x40] ss:$8 sps:$4 sm:$0xff]  }
  0xc8   :  { %348 = vmatmul.mubr.bf16.gmra.mrb[4].mxu0 %v3038_v24 }
  0xc9   :  { %2194 = vmatpush3.bf16.msra.mxu0 %v2433_v25  ;;  %525 = vmatprep.mubr.bf16.mxu0 %v3029_v11  ;;  %v2457_v25 = vld [vmem:[#allocation12 + $0xd0] ss:$8 sps:$4 sm:$0xff]  }
  0xca   :  { %2195 = vmatprep.subr.bf16.mxu0 %v2434_v26  ;;  %v2458_v26 = vld [vmem:[#allocation12 + $0x50] ss:$8 sps:$4 sm:$0xff]  }
  0xcd   :  { %2196 = vmatpush3.bf16.msra.mxu0 %v2435_v27  ;;  %v2459_v27 = vld [vmem:[#allocation12 + $0xe0] ss:$8 sps:$4 sm:$0xff]  }
  0xce   :  { %2197 = vmatprep.subr.bf16.mxu0 %v2436_v28  ;;  %v2460_v28 = vld [vmem:[#allocation12 + $0x60] ss:$8 sps:$4 sm:$0xff]  }
  0xd1   :  { %2198 = vmatpush3.bf16.msra.mxu0 %v2437_v29  ;;  %v2461_v29 = vld [vmem:[#allocation12 + $0xf0] ss:$8 sps:$4 sm:$0xff]  }
  0xd2   :  { %2199 = vmatprep.subr.bf16.mxu0 %v2440_v30  ;;  %v2462_v30 = vld [vmem:[#allocation12 + $0x70] ss:$8 sps:$4 sm:$0xff]  }
  0xd5   :  { %2200 = vmatpush3.bf16.msra.mxu0 %v2442_v31 }
  0xd6   :  { %2201 = vmatprep.subr.bf16.mxu0 %v2443_v32 }
  0xd9   :  { %2202 = vmatpush3.bf16.msra.mxu0 %v2444_v33 }
  0xda   :  { %2203 = vmatprep.subr.bf16.mxu0 %v2445_v34 }
  0xdd   :  { %2204 = vmatpush3.bf16.msra.mxu0 %v2446_v35 }
  0xde   :  { %2217 = vmatprep.subr.bf16.mxu0 %v2447_v12 }
  0xe0   :  { %526 = vmatmul.mubr.bf16.vlgmr.msra.gmra.mrb[8].mxu0 %v3032_v18 }
  0xe1   :  { %533 = vmatprep.mubr.bf16.mxu0 %v3034_v20  ;;  %2218 = vmatpush3.bf16.msra.mxu0 %v2448_v13 }
  0xe2   :  { %2219 = vmatprep.subr.bf16.mxu0 %v2449_v14 }
  0xe5   :  { %2220 = vmatpush3.bf16.msra.mxu0 %v2450_v15 }
  0xe6   :  { %2221 = vmatprep.subr.bf16.mxu0 %v2451_v16 }
  0xe8   :  { %534 = vmatmul.mubr.bf16.gmra.mrb[12].mxu0 %v3038_v24 }
  0xe9   :  { %711 = vmatprep.mubr.bf16.mxu0 %v3029_v11  ;;  %2222 = vmatpush3.bf16.msra.mxu0 %v2452_v17 }
  0xea   :  { %2223 = vmatprep.subr.bf16.mxu0 %v2453_v19 }
  0xed   :  { %2224 = vmatpush3.bf16.msra.mxu0 %v2454_v21 }
  0xee   :  { %2225 = vmatprep.subr.bf16.mxu0 %v2455_v22  ;;  %v2467_v22 = vld [vmem:[#allocation6 + $0x84] ss:$8 sps:$4 sm:$0xff]  }
  0xf1   :  { %2226 = vmatpush3.bf16.msra.mxu0 %v2456_v23  ;;  %v2468_v23 = vld [vmem:[#allocation6 + $0x4] ss:$8 sps:$4 sm:$0xff]  }
  0xf2   :  { %2227 = vmatprep.subr.bf16.mxu0 %v2457_v25  ;;  %v2471_v25 = vld [vmem:[#allocation6 + $0x94] ss:$8 sps:$4 sm:$0xff]  }
  0xf5   :  { %2228 = vmatpush3.bf16.msra.mxu0 %v2458_v26  ;;  %v2472_v26 = vld [vmem:[#allocation6 + $0x14] ss:$8 sps:$4 sm:$0xff]  }
  0xf6   :  { %2229 = vmatprep.subr.bf16.mxu0 %v2459_v27  ;;  %v2475_v27 = vld [vmem:[#allocation6 + $0xa4] ss:$8 sps:$4 sm:$0xff]  }
  0xf9   :  { %2230 = vmatpush3.bf16.msra.mxu0 %v2460_v28  ;;  %v2476_v28 = vld [vmem:[#allocation6 + $0x24] ss:$8 sps:$4 sm:$0xff]  }
  0xfa   :  { %2231 = vmatprep.subr.bf16.mxu0 %v2461_v29  ;;  %v2479_v29 = vld [vmem:[#allocation6 + $0xb4] ss:$8 sps:$4 sm:$0xff]  }
  0xfd   :  { %2232 = vmatpush3.bf16.msra.mxu0 %v2462_v30  ;;  %v2480_v30 = vld [vmem:[#allocation6 + $0x34] ss:$8 sps:$4 sm:$0xff]  }
  0xfe   :  { %2253 = vmatprep.subr.bf16.mxu0 %v2467_v22 }
 0x100   :  { %712 = vmatmul.mubr.bf16.vlgmr.msra.gmra.mrb[16].mxu0 %v3032_v18 }
 0x101   :  { %719 = vmatprep.mubr.bf16.mxu0 %v3034_v20  ;;  %2254 = vmatpush3.bf16.msra.mxu0 %v2468_v23 }
 0x102   :  { %2255 = vmatprep.subr.bf16.mxu0 %v2471_v25 }
 0x105   :  { %2256 = vmatpush3.bf16.msra.mxu0 %v2472_v26 }
 0x106   :  { %2257 = vmatprep.subr.bf16.mxu0 %v2475_v27 }
 0x108   :  { %720 = vmatmul.mubr.bf16.gmra.mrb[20].mxu0 %v3038_v24 }
 0x109   :  { %1118 = vmatprep.mubr.bf16.mxu0 %v3029_v11  ;;  %2258 = vmatpush3.bf16.msra.mxu0 %v2476_v28 }
 0x10a   :  { %2259 = vmatprep.subr.bf16.mxu0 %v2479_v29 }
 0x10d   :  { %2260 = vmatpush3.bf16.msra.mxu0 %v2480_v30 }
 0x193   :  { %v2177_v37 = vpop.f32.mrb[0].mxu0 }
 0x194   :  { %v2178_v38 = vpop.f32.mrb[1].mxu0 }
 0x195   :  { %v2179_v39 = vadd.f32 %v2178_v38, %v2177_v37  ;;  %v2180_v40 = vpop.f32.mrb[2].mxu0 }
 0x196   :  { %v2181_v42 = vpop.f32.mrb[3].mxu0 }
 0x197   :  { %v2182_v43 = vadd.f32 %v2181_v42, %v2180_v40  ;;  %v342_v44 = vadd.f32 %v2179_v39, %v2019_v41 }
 0x199   :  { %v345_v45 = vadd.f32 %v2182_v43, %v2019_v41 }
 0x19b   :  { %v2183_v46 = vpop.f32.mrb[4].mxu0  ;;  %v356_v47 = vpack.c.bf16 %v345_v45, %v342_v44 }
 0x19c   :  { %v2184_v48 = vpop.f32.mrb[5].mxu0 }
 0x19d   :  { %v2185_v49 = vadd.f32 %v2184_v48, %v2183_v46  ;;  %v2186_v50 = vpop.f32.mrb[6].mxu0 }
 0x19e   :  { %v2187_v51 = vpop.f32.mrb[7].mxu0 }
 0x19f   :  { %v350_v52 = vadd.f32 %v2185_v49, %v2019_v41  ;;  %v2188_v53 = vadd.f32 %v2187_v51, %v2186_v50 }
 0x1a1   :  { %v353_v54 = vadd.f32 %v2188_v53, %v2019_v41 }
 0x1a3   :  { %v357_v55 = vpack.c.bf16 %v353_v54, %v350_v52 }
 0x1b3   :  { %v2205_v56 = vpop.f32.mrb[8].mxu0 }
 0x1b4   :  { %v2206_v57 = vpop.f32.mrb[9].mxu0 }
 0x1b5   :  { %v2207_v58 = vadd.f32 %v2206_v57, %v2205_v56  ;;  %v2208_v59 = vpop.f32.mrb[10].mxu0 }
 0x1b6   :  { %v2209_v61 = vpop.f32.mrb[11].mxu0 }
 0x1b7   :  { %v2210_v62 = vadd.f32 %v2209_v61, %v2208_v59  ;;  %v528_v63 = vadd.f32 %v2207_v58, %v2040_v60 }
 0x1b9   :  { %v531_v0 = vadd.f32 %v2210_v62, %v2040_v60 }
 0x1bb   :  { %v2211_v1 = vpop.f32.mrb[12].mxu0  ;;  %v542_v2 = vpack.c.bf16 %v531_v0, %v528_v63 }
 0x1bc   :  { %v2212_v3 = vpop.f32.mrb[13].mxu0 }
 0x1bd   :  { %v2213_v4 = vadd.f32 %v2212_v3, %v2211_v1  ;;  %v2214_v5 = vpop.f32.mrb[14].mxu0  ;;  %2346 = vmatpush3.bf16.xpose.msra.mxu1 %v542_v2 }
 0x1be   :  { %v2215_v6 = vpop.f32.mrb[15].mxu0  ;;  %2351 = vmatprep.subr.bf16.mxu1 %v2837_v36 }
 0x1bf   :  { %v2216_v7 = vadd.f32 %v2215_v6, %v2214_v5  ;;  %v536_v8 = vadd.f32 %v2213_v4, %v2040_v60  ;;  %v2057_v6 = vld [vmem:[#allocation14] ss:$0 sm:$0xff] }
 0x1c1   :  { %v539_v9 = vadd.f32 %v2216_v7, %v2040_v60 }
 0x1c3   :  { %v543_v10 = vpack.c.bf16 %v539_v9, %v536_v8 }
 0x1c4   :  { %2348 = vmatmul.mubr.bf16.vlgmr.msra.gmra.mrb[0].mxu1 %v356_v47 }
 0x1c5   :  { %2352 = vmatpush3.bf16.xpose.msra.mxu1 %v543_v10  ;;  %2353 = vmatprep.mubr.msk.bf16.mxu1 %vm2838_vm0, %v2837_v36 }
 0x1c6   :  { %2357 = vmatprep.subr.bf16.mxu1 %v2837_v36 }
 0x1cc   :  { %2354 = vmatmul.mubr.bf16.vlgmr.msra.gmra.mrb[4].mxu1 %v357_v55 }
 0x1cd   :  { %2359 = vmatprep.mubr.msk.bf16.mxu1 %vm2838_vm0, %v2837_v36 }
 0x1d3   :  { %v2233_v0 = vpop.f32.mrb[16].mxu0 }
 0x1d4   :  { %v2234_v1 = vpop.f32.mrb[17].mxu0 }
 0x1d5   :  { %v2236_v2 = vpop.f32.mrb[18].mxu0  ;;  %v2235_v4 = vadd.f32 %v2234_v1, %v2233_v0  ;;  %v2481_v0 = vld [vmem:[#allocation9 + $0xd4] ss:$8 sps:$4 sm:$0xff]  }
 0x1d6   :  { %v2237_v3 = vpop.f32.mrb[19].mxu0  ;;  %v2482_v1 = vld [vmem:[#allocation9 + $0x54] ss:$8 sps:$4 sm:$0xff]  }
 0x1d7   :  { %v2238_v5 = vadd.f32 %v2237_v3, %v2236_v2  ;;  %v714_v7 = vadd.f32 %v2235_v4, %v2057_v6  ;;  %v2485_v2 = vld [vmem:[#allocation9 + $0xe4] ss:$8 sps:$4 sm:$0xff]   ;;  %v2489_v3 = vld [vmem:[#allocation9 + $0xf4] ss:$8 sps:$4 sm:$0xff]  }
 0x1d8   :  { %v2490_v4 = vld [vmem:[#allocation9 + $0x74] ss:$8 sps:$4 sm:$0xff]  }
 0x1d9   :  { %v717_v8 = vadd.f32 %v2238_v5, %v2057_v6 }
 0x1db   :  { %v728_v9 = vpack.c.bf16 %v717_v8, %v714_v7  ;;  %v2239_v10 = vpop.f32.mrb[20].mxu0 }
 0x1dc   :  { %v2240_v12 = vpop.f32.mrb[21].mxu0 }
 0x1dd   :  { %v2242_v13 = vpop.f32.mrb[22].mxu0  ;;  %2358 = vmatpush3.bf16.msra.mxu1 %v728_v9  ;;  %v2241_v15 = vadd.f32 %v2240_v12, %v2239_v10  ;;  %v2076_v9 = vld [vmem:[#allocation8 + $0x1] ss:$0 sm:$0xff] }
 0x1de   :  { %v2243_v14 = vpop.f32.mrb[23].mxu0  ;;  %2363 = vmatprep.subr.bf16.mxu1 %v2837_v36 }
 0x1df   :  { %v2244_v16 = vadd.f32 %v2243_v14, %v2242_v13  ;;  %v722_v17 = vadd.f32 %v2241_v15, %v2057_v6 }
 0x1e1   :  { %v725_v19 = vadd.f32 %v2244_v16, %v2057_v6 }
 0x1e3   :  { %v729_v21 = vpack.c.bf16 %v725_v19, %v722_v17 }
 0x297   :  { %v764_v31 = vpop.f32.mrb[0].mxu1 }
 0x298   :  { %v2349_v32 = vpop.f32.mrb[1].mxu1  ;;  %v813_v33 = vsel %vm812_vm1, %v764_v31, -inf }
 0x299   :  { %814 = vmax.xlane.f32.xlu0 %v813_v33  ;;  %v767_v34 = vpop.f32.mrb[2].mxu1  ;;  %v2484_v32 = vld [vmem:[#allocation6 + $0x44] ss:$8 sps:$4 sm:$0xff]   ;;  %v2487_v33 = vld [vmem:[#allocation6 + $0xd4] ss:$8 sps:$4 sm:$0xff]  }
 0x29a   :  { %v2350_v35 = vpop.f32.mrb[3].mxu1  ;;  %v816_v37 = vsel %vm812_vm1, %v767_v34, -inf }
 0x29b   :  { %v2491_v35 = vld [vmem:[#allocation6 + $0xe4] ss:$8 sps:$4 sm:$0xff]  }
 0x29d   :  { %817 = vmax.xlane.f32.xlu0 %v816_v37  ;;  %v2492_v37 = vld [vmem:[#allocation6 + $0x64] ss:$8 sps:$4 sm:$0xff]  }
 0x29f   :  { %v805_v38 = vpop.f32.mrb[4].mxu1 }
 0x2a0   :  { %v2355_v39 = vpop.f32.mrb[5].mxu1  ;;  %v819_v40 = vsel %vm812_vm1, %v805_v38, -inf }
 0x2a1   :  { %820 = vmax.xlane.f32.xlu1 %v819_v40  ;;  %v808_v41 = vpop.f32.mrb[6].mxu1  ;;  %v2494_v39 = vld [vmem:[#allocation6 + $0x74] ss:$8 sps:$4 sm:$0xff]  }
 0x2a2   :  { %v2356_v42 = vpop.f32.mrb[7].mxu1  ;;  %v822_v43 = vsel %vm812_vm1, %v808_v41, -inf }
 0x2a5   :  { %823 = vmax.xlane.f32.xlu1 %v822_v43 }
 0x326   :  { %v815_v44 = vpop.xlane.xlu0 %814 }
 0x327   :  { %v825_v45 = vsub.f32 %v764_v31, %v815_v44  ;;  %v2483_v31 = vld [vmem:[#allocation6 + $0xc4] ss:$8 sps:$4 sm:$0xff]  }
 0x328   :  { %2261 = vmatprep.subr.bf16.mxu0 %v2483_v31 }
 0x329   :  { %v829_v46 = vmul.f32 1.442695, %v825_v45  ;;  %2262 = vmatpush3.bf16.msra.mxu0 %v2484_v32 }
 0x32a   :  { %v818_v47 = vpop.xlane.xlu0 %817  ;;  %2263 = vmatprep.subr.bf16.mxu0 %v2487_v33 }
 0x32b   :  { %2559 = vpow2.f32 %v829_v46  ;;  %v826_v48 = vsub.f32 %v767_v34, %v818_v47  ;;  %v2488_v34 = vld [vmem:[#allocation6 + $0x54] ss:$8 sps:$4 sm:$0xff]  }
 0x32d   :  { %v831_v49 = vmul.f32 1.442695, %v826_v48  ;;  %2264 = vmatpush3.bf16.msra.mxu0 %v2488_v34 }
 0x32e   :  { %v821_v50 = vpop.xlane.xlu1 %820  ;;  %2265 = vmatprep.subr.bf16.mxu0 %v2491_v35 }
 0x32f   :  { %2561 = vpow2.f32 %v831_v49  ;;  %v827_v51 = vsub.f32 %v805_v38, %v821_v50  ;;  %v2493_v38 = vld [vmem:[#allocation6 + $0xf4] ss:$8 sps:$4 sm:$0xff]   ;;  %v2463_v49 = vld [vmem:[#allocation9 + $0x84] ss:$8 sps:$4 sm:$0xff]  }
 0x331   :  { %v833_v52 = vmul.f32 1.442695, %v827_v51  ;;  %2266 = vmatpush3.bf16.msra.mxu0 %v2492_v37 }
 0x332   :  { %v824_v53 = vpop.xlane.xlu1 %823  ;;  %2267 = vmatprep.subr.bf16.mxu0 %v2493_v38 }
 0x333   :  { %2563 = vpow2.f32 %v833_v52  ;;  %v828_v54 = vsub.f32 %v808_v41, %v824_v53 }
 0x335   :  { %v3063_v55 = vpop.eup %2559  ;;  %v835_v56 = vmul.f32 1.442695, %v828_v54  ;;  %2268 = vmatpush3.bf16.msra.mxu0 %v2494_v39  ;;  %v2464_v54 = vld [vmem:[#allocation9 + $0x4] ss:$8 sps:$4 sm:$0xff]  }
 0x336   :  { %v837_v57 = vsel %vm812_vm1, %v3063_v55, 0.0 }
 0x337   :  { %2565 = vpow2.f32 %v835_v56  ;;  %838 = vadd.xlane.f32.xlu0 %v837_v57  ;;  %v2466_v57 = vld [vmem:[#allocation9 + $0x14] ss:$8 sps:$4 sm:$0xff]  }
 0x338   :  { %1119 = vmatmul.mubr.bf16.vlgmr.msra.gmra.mrb[24].mxu0 %v3032_v18 }
 0x339   :  { %v3067_v58 = vpop.eup %2561  ;;  %1126 = vmatprep.mubr.bf16.mxu0 %v3034_v20 }
 0x33a   :  { %v840_v59 = vsel %vm812_vm1, %v3067_v58, 0.0 }
 0x33b   :  { %841 = vadd.xlane.f32.xlu1 %v840_v59  ;;  %v2470_v59 = vld [vmem:[#allocation9 + $0x24] ss:$8 sps:$4 sm:$0xff]  }
 0x33d   :  { %v3071_v60 = vpop.eup %2563 }
 0x33e   :  { %v843_v61 = vsel %vm812_vm1, %v3071_v60, 0.0 }
 0x33f   :  { %844 = vadd.xlane.f32.xlu0 %v843_v61  ;;  %v2473_v61 = vld [vmem:[#allocation9 + $0xb4] ss:$8 sps:$4 sm:$0xff]  }
 0x340   :  { %1127 = vmatmul.mubr.bf16.gmra.mrb[28].mxu0 %v3038_v24 }
 0x341   :  { %v3075_v62 = vpop.eup %2565  ;;  %1490 = vmatprep.mubr.bf16.mxu0 %v3029_v11 }
 0x342   :  { %v846_v63 = vsel %vm812_vm1, %v3075_v62, 0.0 }
 0x343   :  { %847 = vadd.xlane.f32.xlu1 %v846_v63  ;;  %v2474_v63 = vld [vmem:[#allocation9 + $0x34] ss:$8 sps:$4 sm:$0xff]  }
 0x3c4   :  { %v839_v40 = vpop.xlane.xlu0 %838 }
 0x3c5   :  { %2567 = vrcp.f32 %v839_v40  ;;  %v2093_v40 = vld [vmem:[#allocation11 + $0x1] ss:$0 sm:$0xff] }
 0x3c8   :  { %v842_v41 = vpop.xlane.xlu1 %841 }
 0x3c9   :  { %2569 = vrcp.f32 %v842_v41 }
 0x3cc   :  { %v845_v42 = vpop.xlane.xlu0 %844 }
 0x3cd   :  { %2571 = vrcp.f32 %v845_v42 }
 0x3cf   :  { %v2568_v44 = vpop.eup %2567 }
 0x3d0   :  { %v848_v43 = vpop.xlane.xlu1 %847  ;;  %v853_v46 = vmul.f32 %v2568_v44, %v3063_v55  ;;  %v2465_v55 = vld [vmem:[#allocation9 + $0x94] ss:$8 sps:$4 sm:$0xff]  }
 0x3d1   :  { %2573 = vrcp.f32 %v848_v43 }
 0x3d3   :  { %v2570_v45 = vpop.eup %2569 }
 0x3d4   :  { %v854_v47 = vmul.f32 %v2570_v45, %v3067_v58  ;;  %v2469_v58 = vld [vmem:[#allocation9 + $0xa4] ss:$8 sps:$4 sm:$0xff]  }
 0x3d6   :  { %v857_v48 = vpack.c.bf16 %v854_v47, %v853_v46 }
 0x3d7   :  { %v2572_v50 = vpop.eup %2571 }
 0x3d8   :  { %2360 = vmatmul.mubr.msk.bf16.vlgmr.msra.gmra.mrb[8].mxu1 %vm812_vm1, %v857_v48  ;;  %v855_v52 = vmul.f32 %v2572_v50, %v3071_v60  ;;  %v2477_v60 = vld [vmem:[#allocation9 + $0xc4] ss:$8 sps:$4 sm:$0xff]  }
 0x3d9   :  { %2364 = vmatpush3.bf16.msra.mxu1 %v729_v21  ;;  %2365 = vmatprep.mubr.msk.bf16.mxu1 %vm2838_vm0, %v2837_v36 }
 0x3da   :  { %2281 = vmatprep.subr.bf16.mxu1 %v2463_v49 }
 0x3db   :  { %v2574_v51 = vpop.eup %2573 }
 0x3dc   :  { %v856_v53 = vmul.f32 %v2574_v51, %v3075_v62  ;;  %v2478_v62 = vld [vmem:[#allocation9 + $0x44] ss:$8 sps:$4 sm:$0xff]  }
 0x3de   :  { %v858_v56 = vpack.c.bf16 %v856_v53, %v855_v52 }
 0x3e0   :  { %2366 = vmatmul.mubr.msk.bf16.vlgmr.msra.gmra.mrb[12].mxu1 %vm812_vm1, %v858_v56  ;;  %v2495_v56 = vld [vmem:[#allocation12 + $0x84] ss:$8 sps:$4 sm:$0xff]  }
 0x3e1   :  { %2282 = vmatpush3.bf16.msra.mxu1 %v2464_v54  ;;  %1304 = vmatprep.mubr.bf16.mxu1 %v3029_v11  ;;  %v2486_v11 = vld [vmem:[#allocation9 + $0x64] ss:$8 sps:$4 sm:$0xff]  }
 0x3e2   :  { %2283 = vmatprep.subr.bf16.mxu1 %v2465_v55  ;;  %v2496_v55 = vld [vmem:[#allocation12 + $0x4] ss:$8 sps:$4 sm:$0xff]   ;;  %2309 = vmatprep.subr.bf16.mxu0 %v2495_v56 }
 0x3e3   :  { %2310 = vmatpush3.bf16.msra.mxu0 %v2496_v55 }
 0x3e5   :  { %2284 = vmatpush3.bf16.msra.mxu1 %v2466_v57  ;;  %v2497_v57 = vld [vmem:[#allocation12 + $0x94] ss:$8 sps:$4 sm:$0xff]  }
 0x3e6   :  { %2285 = vmatprep.subr.bf16.mxu1 %v2469_v58  ;;  %v2498_v58 = vld [vmem:[#allocation12 + $0x14] ss:$8 sps:$4 sm:$0xff]   ;;  %2311 = vmatprep.subr.bf16.mxu0 %v2497_v57 }
 0x3e7   :  { %2312 = vmatpush3.bf16.msra.mxu0 %v2498_v58 }
 0x3e9   :  { %2286 = vmatpush3.bf16.msra.mxu1 %v2470_v59  ;;  %v2499_v59 = vld [vmem:[#allocation12 + $0xa4] ss:$8 sps:$4 sm:$0xff]  }
 0x3ea   :  { %2287 = vmatprep.subr.bf16.mxu1 %v2473_v61  ;;  %v2500_v61 = vld [vmem:[#allocation12 + $0x24] ss:$8 sps:$4 sm:$0xff]   ;;  %2313 = vmatprep.subr.bf16.mxu0 %v2499_v59 }
 0x3eb   :  { %2314 = vmatpush3.bf16.msra.mxu0 %v2500_v61 }
 0x3ed   :  { %2288 = vmatpush3.bf16.msra.mxu1 %v2474_v63  ;;  %v2501_v63 = vld [vmem:[#allocation12 + $0xb4] ss:$8 sps:$4 sm:$0xff]  }
 0x3ee   :  { %2289 = vmatprep.subr.bf16.mxu1 %v2477_v60  ;;  %v2502_v60 = vld [vmem:[#allocation12 + $0x34] ss:$8 sps:$4 sm:$0xff]   ;;  %2315 = vmatprep.subr.bf16.mxu0 %v2501_v63 }
 0x3ef   :  { %2316 = vmatpush3.bf16.msra.mxu0 %v2502_v60 }
 0x3f1   :  { %2290 = vmatpush3.bf16.msra.mxu1 %v2478_v62  ;;  %v2503_v62 = vld [vmem:[#allocation12 + $0xc4] ss:$8 sps:$4 sm:$0xff]  }
 0x3f2   :  { %2291 = vmatprep.subr.bf16.mxu1 %v2481_v0  ;;  %v2504_v0 = vld [vmem:[#allocation12 + $0x44] ss:$8 sps:$4 sm:$0xff]   ;;  %2317 = vmatprep.subr.bf16.mxu0 %v2503_v62 }
 0x3f3   :  { %2318 = vmatpush3.bf16.msra.mxu0 %v2504_v0 }
 0x3f5   :  { %2292 = vmatpush3.bf16.msra.mxu1 %v2482_v1  ;;  %v2505_v1 = vld [vmem:[#allocation12 + $0xd4] ss:$8 sps:$4 sm:$0xff]  }
 0x3f6   :  { %2293 = vmatprep.subr.bf16.mxu1 %v2485_v2  ;;  %v2506_v2 = vld [vmem:[#allocation12 + $0x54] ss:$8 sps:$4 sm:$0xff]   ;;  %2319 = vmatprep.subr.bf16.mxu0 %v2505_v1 }
 0x3f7   :  { %2320 = vmatpush3.bf16.msra.mxu0 %v2506_v2 }
 0x3f9   :  { %2294 = vmatpush3.bf16.msra.mxu1 %v2486_v11  ;;  %v2507_v11 = vld [vmem:[#allocation12 + $0xe4] ss:$8 sps:$4 sm:$0xff]  }
 0x3fa   :  { %2295 = vmatprep.subr.bf16.mxu1 %v2489_v3  ;;  %v2508_v3 = vld [vmem:[#allocation12 + $0x64] ss:$8 sps:$4 sm:$0xff]   ;;  %2321 = vmatprep.subr.bf16.mxu0 %v2507_v11 }
 0x3fb   :  { %2322 = vmatpush3.bf16.msra.mxu0 %v2508_v3  ;;  %v2513_v11 = vld [vmem:[#allocation15 + $0x4] ss:$8 sps:$4 sm:$0xff]  }
 0x3fd   :  { %2296 = vmatpush3.bf16.msra.mxu1 %v2490_v4  ;;  %v2509_v4 = vld [vmem:[#allocation12 + $0xf4] ss:$8 sps:$4 sm:$0xff]  }
 0x3fe   :  { %2369 = vmatprep.subr.bf16.mxu1 %v2837_v36  ;;  %2323 = vmatprep.subr.bf16.mxu0 %v2509_v4 }
 0x400   :  { %1305 = vmatmul.mubr.bf16.vlgmr.msra.gmra.mrb[16].mxu1 %v3032_v18 }
 0x401   :  { %1312 = vmatprep.mubr.bf16.mxu1 %v3034_v20 }
 0x408   :  { %1313 = vmatmul.mubr.bf16.gmra.mrb[20].mxu1 %v3038_v24 }
 0x409   :  { %2371 = vmatprep.mubr.msk.bf16.mxu1 %vm2838_vm0, %v2837_v36 }
 0x40b   :  { %v2269_v5 = vpop.f32.mrb[24].mxu0 }
 0x40c   :  { %v2270_v6 = vpop.f32.mrb[25].mxu0 }
 0x40d   :  { %v2272_v7 = vpop.f32.mrb[26].mxu0  ;;  %v2271_v10 = vadd.f32 %v2270_v6, %v2269_v5  ;;  %v2510_v5 = vld [vmem:[#allocation12 + $0x74] ss:$8 sps:$4 sm:$0xff]  }
 0x40e   :  { %v2273_v8 = vpop.f32.mrb[27].mxu0  ;;  %2324 = vmatpush3.bf16.msra.mxu0 %v2510_v5  ;;  %v2591_v6 = vld [vmem:[#allocation3] ss:$8 sps:$4 sm:$0xff]  }
 0x40f   :  { %v2274_v12 = vadd.f32 %v2273_v8, %v2272_v7  ;;  %v1121_v13 = vadd.f32 %v2271_v10, %v2076_v9  ;;  %2387 = vmatprep.subr.bf16.mxu0 %v2837_v36  ;;  %v2592_v7 = vld [vmem:[#allocation3 + $0x14] ss:$8 sps:$4 sm:$0xff]   ;;  %v2593_v8 = vld [vmem:[#allocation3 + $0x10] ss:$8 sps:$4 sm:$0xff]  }
 0x411   :  { %v1124_v14 = vadd.f32 %v2274_v12, %v2076_v9  ;;  %1491 = vmatmul.mubr.bf16.vlgmr.msra.gmra.mrb[32].mxu0 %v2591_v6 }
 0x412   :  { %1498 = vmatprep.mubr.bf16.mxu0 %v2592_v7 }
 0x413   :  { %v1135_v15 = vpack.c.bf16 %v1124_v14, %v1121_v13  ;;  %v2275_v16 = vpop.f32.mrb[28].mxu0 }
 0x414   :  { %v2276_v17 = vpop.f32.mrb[29].mxu0 }
 0x415   :  { %v2278_v18 = vpop.f32.mrb[30].mxu0  ;;  %v2277_v20 = vadd.f32 %v2276_v17, %v2275_v16 }
 0x416   :  { %v2279_v19 = vpop.f32.mrb[31].mxu0 }
 0x417   :  { %v2280_v21 = vadd.f32 %v2279_v19, %v2278_v18  ;;  %v1129_v24 = vadd.f32 %v2277_v20, %v2076_v9 }
 0x419   :  { %v1132_v22 = vadd.f32 %v2280_v21, %v2076_v9  ;;  %1499 = vmatmul.mubr.bf16.gmra.mrb[36].mxu0 %v2593_v8 }
 0x41a   :  { %2389 = vmatprep.mubr.msk.bf16.mxu0 %vm2838_vm0, %v2837_v36 }
 0x41b   :  { %v1136_v23 = vpack.c.bf16 %v1132_v22, %v1129_v24 }
 0x4ab   :  { %v3099_v25 = vpop.f32.mrb[8].mxu1 }
 0x4ac   :  { %v2361_v26 = vpop.f32.mrb[9].mxu1 }
 0x4ad   :  { %v3101_v27 = vpop.f32.mrb[10].mxu1 }
 0x4ae   :  { %v947_v28 = vpack.c.bf16 %v3101_v27, %v3099_v25  ;;  %v2362_v29 = vpop.f32.mrb[11].mxu1 }
 0x4b3   :  { %v3105_v30 = vpop.f32.mrb[12].mxu1 }
 0x4b4   :  { %v2367_v31 = vpop.f32.mrb[13].mxu1 }
 0x4b5   :  { %v3107_v32 = vpop.f32.mrb[14].mxu1 }
 0x4b6   :  { %v948_v33 = vpack.c.bf16 %v3107_v32, %v3105_v30  ;;  %v2368_v34 = vpop.f32.mrb[15].mxu1 }
 0x4d3   :  { %v2297_v35 = vpop.f32.mrb[16].mxu1 }
 0x4d4   :  { %v2298_v37 = vpop.f32.mrb[17].mxu1 }
 0x4d5   :  { %v2299_v38 = vadd.f32 %v2298_v37, %v2297_v35  ;;  %v2300_v39 = vpop.f32.mrb[18].mxu1 }
 0x4d6   :  { %v2301_v41 = vpop.f32.mrb[19].mxu1 }
 0x4d7   :  { %v2302_v42 = vadd.f32 %v2301_v41, %v2300_v39  ;;  %v1307_v43 = vadd.f32 %v2299_v38, %v2093_v40 }
 0x4d9   :  { %v1310_v44 = vadd.f32 %v2302_v42, %v2093_v40 }
 0x4db   :  { %v1321_v45 = vpack.c.bf16 %v1310_v44, %v1307_v43  ;;  %v2303_v46 = vpop.f32.mrb[20].mxu1 }
 0x4dc   :  { %v2304_v47 = vpop.f32.mrb[21].mxu1 }
 0x4dd   :  { %v2305_v48 = vadd.f32 %v2304_v47, %v2303_v46  ;;  %v2306_v49 = vpop.f32.mrb[22].mxu1  ;;  %2370 = vmatpush3.bf16.xpose.msra.mxu1 %v1321_v45 }
 0x4de   :  { %v2307_v50 = vpop.f32.mrb[23].mxu1  ;;  %2375 = vmatprep.subr.bf16.mxu1 %v2837_v36 }
 0x4df   :  { %v2308_v51 = vadd.f32 %v2307_v50, %v2306_v49  ;;  %v1315_v52 = vadd.f32 %v2305_v48, %v2093_v40 }
 0x4e1   :  { %v1318_v53 = vadd.f32 %v2308_v51, %v2093_v40 }
 0x4e3   :  { %v1322_v54 = vpack.c.bf16 %v1318_v53, %v1315_v52  ;;  %v2110_v52 = vld [vmem:[#allocation14 + $0x1] ss:$0 sm:$0xff] }
 0x4e4   :  { %2372 = vmatmul.mubr.bf16.vlgmr.msra.gmra.mrb[24].mxu1 %v1135_v15 }
 0x4e5   :  { %2376 = vmatpush3.bf16.xpose.msra.mxu1 %v1322_v54  ;;  %2377 = vmatprep.mubr.msk.bf16.mxu1 %vm2838_vm0, %v2837_v36 }
 0x4e6   :  { %2381 = vmatprep.subr.bf16.mxu1 %v2837_v36 }
 0x4ec   :  { %2378 = vmatmul.mubr.bf16.vlgmr.msra.gmra.mrb[28].mxu1 %v1136_v23 }
 0x4ed   :  { %2383 = vmatprep.mubr.msk.bf16.mxu1 %vm2838_vm0, %v2837_v36  ;;  %v2325_v36 = vpop.f32.mrb[32].mxu0 }
 0x4ee   :  { %v2326_v24 = vpop.f32.mrb[33].mxu0 }
 0x4ef   :  { %v2327_v22 = vadd.f32 %v2326_v24, %v2325_v36  ;;  %v2328_v23 = vpop.f32.mrb[34].mxu0  ;;  %v2522_v24 = vld [vmem:[#allocation15 + $0x34] ss:$8 sps:$4 sm:$0xff]  }
 0x4f0   :  { %v2329_v53 = vpop.f32.mrb[35].mxu0 }
 0x4f1   :  { %v1493_v54 = vadd.f32 %v2327_v22, %v2110_v52  ;;  %v2330_v56 = vadd.f32 %v2329_v53, %v2328_v23  ;;  %v2331_v58 = vpop.f32.mrb[36].mxu0  ;;  %v2520_v22 = vld [vmem:[#allocation15 + $0x30] ss:$8 sps:$4 sm:$0xff]   ;;  %v2525_v23 = vld [vmem:[#allocation15 + $0x44] ss:$8 sps:$4 sm:$0xff]  }
 0x4f2   :  { %v2332_v59 = vpop.f32.mrb[37].mxu0  ;;  %v2558_v53 = vld [vmem:[#allocation15 + $0xf4] ss:$8 sps:$4 sm:$0xff]  }
 0x4f3   :  { %v1496_v55 = vadd.f32 %v2330_v56, %v2110_v52  ;;  %v2334_v61 = vpop.f32.mrb[38].mxu0  ;;  %v2333_v60 = vadd.f32 %v2332_v59, %v2331_v58 }
 0x4f4   :  { %v2335_v63 = vpop.f32.mrb[39].mxu0 }
 0x4f5   :  { %v1507_v57 = vpack.c.bf16 %v1496_v55, %v1493_v54  ;;  %v2336_v62 = vadd.f32 %v2335_v63, %v2334_v61  ;;  %v1501_v0 = vadd.f32 %v2333_v60, %v2110_v52  ;;  %v2556_v54 = vld [vmem:[#allocation15 + $0xf0] ss:$8 sps:$4 sm:$0xff]  }
 0x4f7   :  { %2382 = vmatpush3.bf16.msra.mxu1 %v1507_v57  ;;  %v1504_v1 = vadd.f32 %v2336_v62, %v2110_v52  ;;  %v2553_v52 = vld [vmem:[#allocation15 + $0xe0] ss:$8 sps:$4 sm:$0xff]  }
 0x4f8   :  { %1937 = vmatprep.subr.bf16.mxu1 %v2513_v11 }
 0x4f9   :  { %v1508_v2 = vpack.c.bf16 %v1504_v1, %v1501_v0  ;;  %v1767_v1 = vlaneseq }
 0x4fb   :  { %2388 = vmatpush3.bf16.msra.mxu0 %v1508_v2  ;;  %v1768_v2 = vshrl.u32 %v1767_v1, 7 }
 0x4fd   :  { %v1769_v11 = vsub.s32 0, %v1768_v2 }
 0x5b7   :  { %v1543_v9 = vpop.f32.mrb[24].mxu1 }
 0x5b8   :  { %v2373_v10 = vpop.f32.mrb[25].mxu1  ;;  %v1591_v12 = vsel %vm812_vm1, %v1543_v9, -inf }
 0x5b9   :  { %1592 = vmax.xlane.f32.xlu0 %v1591_v12  ;;  %v1546_v13 = vpop.f32.mrb[26].mxu1  ;;  %v2511_v12 = vld [vmem:[#allocation15] ss:$8 sps:$4 sm:$0xff]  }
 0x5ba   :  { %v1594_v14 = vsel %vm812_vm1, %v1546_v13, -inf  ;;  %v2374_v15 = vpop.f32.mrb[27].mxu1 }
 0x5bb   :  { %1595 = vmax.xlane.f32.xlu1 %v1594_v14  ;;  %v2516_v14 = vld [vmem:[#allocation15 + $0x14] ss:$8 sps:$4 sm:$0xff]  }
 0x5bf   :  { %v1584_v16 = vpop.f32.mrb[28].mxu1 }
 0x5c0   :  { %v2379_v17 = vpop.f32.mrb[29].mxu1  ;;  %v1597_v18 = vsel %vm812_vm1, %v1584_v16, -inf }
 0x5c1   :  { %1598 = vmax.xlane.f32.xlu0 %v1597_v18  ;;  %v1587_v19 = vpop.f32.mrb[30].mxu1  ;;  %v2519_v17 = vld [vmem:[#allocation15 + $0x24] ss:$8 sps:$4 sm:$0xff]  }
 0x5c2   :  { %v1600_v20 = vsel %vm812_vm1, %v1587_v19, -inf  ;;  %v2380_v21 = vpop.f32.mrb[31].mxu1 }
 0x5c3   :  { %1601 = vmax.xlane.f32.xlu1 %v1600_v20  ;;  %v2517_v21 = vld [vmem:[#allocation15 + $0x20] ss:$8 sps:$4 sm:$0xff]  }
 0x646   :  { %v1593_v26 = vpop.xlane.xlu0 %1592 }
 0x647   :  { %v1603_v29 = vsub.f32 %v1543_v9, %v1593_v26  ;;  %v2523_v26 = vld [vmem:[#allocation15 + $0x40] ss:$8 sps:$4 sm:$0xff]  }
 0x648   :  { %v1596_v31 = vpop.xlane.xlu1 %1595 }
 0x649   :  { %v1607_v34 = vmul.f32 1.442695, %v1603_v29  ;;  %v1604_v35 = vsub.f32 %v1546_v13, %v1596_v31  ;;  %v2528_v29 = vld [vmem:[#allocation15 + $0x54] ss:$8 sps:$4 sm:$0xff]   ;;  %v2526_v31 = vld [vmem:[#allocation15 + $0x50] ss:$8 sps:$4 sm:$0xff]  }
 0x64b   :  { %2575 = vpow2.f32 %v1607_v34  ;;  %v1609_v37 = vmul.f32 1.442695, %v1604_v35  ;;  %v2531_v34 = vld [vmem:[#allocation15 + $0x64] ss:$8 sps:$4 sm:$0xff]   ;;  %v2529_v35 = vld [vmem:[#allocation15 + $0x60] ss:$8 sps:$4 sm:$0xff]  }
 0x64d   :  { %2577 = vpow2.f32 %v1609_v37  ;;  %v2534_v37 = vld [vmem:[#allocation15 + $0x74] ss:$8 sps:$4 sm:$0xff]  }
 0x64e   :  { %v1599_v38 = vpop.xlane.xlu0 %1598 }
 0x64f   :  { %v1605_v39 = vsub.f32 %v1584_v16, %v1599_v38  ;;  %v2514_v16 = vld [vmem:[#allocation15 + $0x10] ss:$8 sps:$4 sm:$0xff]  }
 0x650   :  { %v1602_v40 = vpop.xlane.xlu1 %1601  ;;  %v2532_v38 = vld [vmem:[#allocation15 + $0x70] ss:$8 sps:$4 sm:$0xff]  }
 0x651   :  { %v1611_v41 = vmul.f32 1.442695, %v1605_v39  ;;  %v1606_v42 = vsub.f32 %v1587_v19, %v1602_v40  ;;  %v2537_v39 = vld [vmem:[#allocation15 + $0x84] ss:$8 sps:$4 sm:$0xff]   ;;  %v2535_v40 = vld [vmem:[#allocation15 + $0x80] ss:$8 sps:$4 sm:$0xff]  }
 0x653   :  { %2579 = vpow2.f32 %v1611_v41  ;;  %v1613_v43 = vmul.f32 1.442695, %v1606_v42  ;;  %v2540_v41 = vld [vmem:[#allocation15 + $0x94] ss:$8 sps:$4 sm:$0xff]   ;;  %v2538_v42 = vld [vmem:[#allocation15 + $0x90] ss:$8 sps:$4 sm:$0xff]  }
 0x655   :  { %v2576_v44 = vpop.eup %2575  ;;  %2581 = vpow2.f32 %v1613_v43  ;;  %v2543_v43 = vld [vmem:[#allocation15 + $0xa4] ss:$8 sps:$4 sm:$0xff]  }
 0x656   :  { %v1615_v45 = vsel %vm812_vm1, %v2576_v44, 0.0 }
 0x657   :  { %v2578_v46 = vpop.eup %2577  ;;  %1616 = vadd.xlane.f32.xlu0 %v1615_v45  ;;  %v2546_v45 = vld [vmem:[#allocation15 + $0xb4] ss:$8 sps:$4 sm:$0xff]  }
 0x658   :  { %v1618_v47 = vsel %vm812_vm1, %v2578_v46, 0.0 }
 0x659   :  { %1619 = vadd.xlane.f32.xlu1 %v1618_v47  ;;  %v2549_v47 = vld [vmem:[#allocation15 + $0xc4] ss:$8 sps:$4 sm:$0xff]  }
 0x65d   :  { %v2580_v48 = vpop.eup %2579 }
 0x65e   :  { %v1621_v49 = vsel %vm812_vm1, %v2580_v48, 0.0 }
 0x65f   :  { %v2582_v50 = vpop.eup %2581  ;;  %1622 = vadd.xlane.f32.xlu0 %v1621_v49  ;;  %v2552_v49 = vld [vmem:[#allocation15 + $0xd4] ss:$8 sps:$4 sm:$0xff]  }
 0x660   :  { %v1624_v51 = vsel %vm812_vm1, %v2582_v50, 0.0 }
 0x661   :  { %1625 = vadd.xlane.f32.xlu1 %v1624_v51  ;;  %v2555_v51 = vld [vmem:[#allocation15 + $0xe4] ss:$8 sps:$4 sm:$0xff]  }
 0x6e4   :  { %v1617_v3 = vpop.xlane.xlu0 %1616 }
 0x6e5   :  { %2583 = vrcp.f32 %v1617_v3  ;;  %v1765_v3 = vld [vmem:[#allocation17] sm:$0x3] }
 0x6e6   :  { %v1620_v4 = vpop.xlane.xlu1 %1619 }
 0x6e7   :  { %2585 = vrcp.f32 %v1620_v4  ;;  %v1773_v4 = vsub.s32 1, %v1768_v2 }
 0x6ec   :  { %v1623_v5 = vpop.xlane.xlu0 %1622 }
 0x6ed   :  { %2587 = vrcp.f32 %v1623_v5  ;;  %v1770_v5 = vrot.slane %v1765_v3, %v1769_v11 }
 0x6ee   :  { %v1626_v6 = vpop.xlane.xlu1 %1625 }
 0x6ef   :  { %v2584_v7 = vpop.eup %2583  ;;  %2589 = vrcp.f32 %v1626_v6  ;;  %v1774_v6 = vrot.slane %v1765_v3, %v1773_v4 }
 0x6f0   :  { %v1631_v9 = vmul.f32 %v2584_v7, %v2576_v44  ;;  %v2541_v44 = vld [vmem:[#allocation15 + $0xa0] ss:$8 sps:$4 sm:$0xff]  }
 0x6f1   :  { %v2586_v8 = vpop.eup %2585 }
 0x6f2   :  { %v1632_v10 = vmul.f32 %v2586_v8, %v2578_v46  ;;  %v2544_v46 = vld [vmem:[#allocation15 + $0xb0] ss:$8 sps:$4 sm:$0xff]  }
 0x6f4   :  { %v1635_v13 = vpack.c.bf16 %v1632_v10, %v1631_v9 }
 0x6f6   :  { %2384 = vmatmul.mubr.msk.bf16.vlgmr.msra.gmra.mrb[32].mxu1 %vm812_vm1, %v1635_v13 }
 0x6f7   :  { %v2588_v15 = vpop.eup %2587  ;;  %1938 = vmatpush1.bf16.msra.mxu1 %v2511_v12 }
 0x6f8   :  { %1939 = vmatprep.subr.bf16.mxu1 %v2516_v14  ;;  %v1633_v19 = vmul.f32 %v2588_v15, %v2580_v48  ;;  %v2547_v48 = vld [vmem:[#allocation15 + $0xc0] ss:$8 sps:$4 sm:$0xff]  }
 0x6f9   :  { %v2590_v18 = vpop.eup %2589 }
 0x6fa   :  { %v1634_v20 = vmul.f32 %v2590_v18, %v2582_v50  ;;  %v2550_v50 = vld [vmem:[#allocation15 + $0xd0] ss:$8 sps:$4 sm:$0xff]  }
 0x6fb   :  { %1940 = vmatpush1.bf16.msra.mxu1 %v2514_v16 }
 0x6fc   :  { %v1636_v36 = vpack.c.bf16 %v1634_v20, %v1633_v19  ;;  %1941 = vmatprep.subr.bf16.mxu1 %v2519_v17 }
 0x6fe   :  { %2390 = vmatmul.mubr.msk.bf16.vlgmr.msra.gmra.mrb[40].mxu0 %vm812_vm1, %v1636_v36 }
 0x6ff   :  { %1942 = vmatpush1.bf16.msra.mxu1 %v2517_v21 }
 0x700   :  { %1943 = vmatprep.subr.bf16.mxu1 %v2522_v24 }
 0x703   :  { %1944 = vmatpush1.bf16.msra.mxu1 %v2520_v22 }
 0x704   :  { %1945 = vmatprep.subr.bf16.mxu1 %v2525_v23 }
 0x707   :  { %1946 = vmatpush1.bf16.msra.mxu1 %v2523_v26 }
 0x708   :  { %1947 = vmatprep.subr.bf16.mxu1 %v2528_v29 }
 0x70b   :  { %1948 = vmatpush1.bf16.msra.mxu1 %v2526_v31 }
 0x70c   :  { %1949 = vmatprep.subr.bf16.mxu1 %v2531_v34 }
 0x70f   :  { %1950 = vmatpush1.bf16.msra.mxu1 %v2529_v35 }
 0x710   :  { %1951 = vmatprep.subr.bf16.mxu1 %v2534_v37 }
 0x713   :  { %1952 = vmatpush1.bf16.msra.mxu1 %v2532_v38 }
 0x714   :  { %1953 = vmatprep.subr.bf16.mxu1 %v2537_v39 }
 0x717   :  { %1954 = vmatpush1.bf16.msra.mxu1 %v2535_v40 }
 0x718   :  { %1955 = vmatprep.subr.bf16.mxu1 %v2540_v41 }
 0x71b   :  { %1956 = vmatpush1.bf16.msra.mxu1 %v2538_v42 }
 0x71c   :  { %1957 = vmatprep.subr.bf16.mxu1 %v2543_v43 }
 0x71f   :  { %1958 = vmatpush1.bf16.msra.mxu1 %v2541_v44 }
 0x720   :  { %1959 = vmatprep.subr.bf16.mxu1 %v2546_v45 }
 0x723   :  { %1960 = vmatpush1.bf16.msra.mxu1 %v2544_v46 }
 0x724   :  { %1961 = vmatprep.subr.bf16.mxu1 %v2549_v47 }
 0x727   :  { %1962 = vmatpush1.bf16.msra.mxu1 %v2547_v48 }
 0x728   :  { %1963 = vmatprep.subr.bf16.mxu1 %v2552_v49 }
 0x72b   :  { %1964 = vmatpush1.bf16.msra.mxu1 %v2550_v50 }
 0x72c   :  { %1965 = vmatprep.subr.bf16.mxu1 %v2555_v51 }
 0x72f   :  { %1966 = vmatpush1.bf16.msra.mxu1 %v2553_v52 }
 0x730   :  { %1967 = vmatprep.subr.bf16.mxu1 %v2558_v53 }
 0x733   :  { %1968 = vmatpush1.bf16.msra.mxu1 %v2556_v54 }
 0x7c9   :  { %v1674_v56 = vpop.f32.mrb[32].mxu1 }
 0x7ca   :  { %v2385_v55 = vpop.f32.mrb[33].mxu1 }
 0x7cb   :  { %v1677_v57 = vpop.f32.mrb[34].mxu1 }
 0x7cc   :  { %v1725_v58 = vpack.c.bf16 %v1677_v57, %v1674_v56  ;;  %v2386_v59 = vpop.f32.mrb[35].mxu1 }
 0x7ce   :  { %1969 = vmatprep.mubr.bf16.mxu1 %v1725_v58 }
 0x7cf   :  { %1970 = vmatmul.mubr.bf16.vlgmr.msra.gmra.mrb[36].mxu1 %v947_v28 }
 0x7d1   :  { %v1718_v61 = vpop.f32.mrb[40].mxu0 }
 0x7d2   :  { %v2391_v63 = vpop.f32.mrb[41].mxu0 }
 0x7d3   :  { %v1721_v60 = vpop.f32.mrb[42].mxu0 }
 0x7d4   :  { %v1726_v62 = vpack.c.bf16 %v1721_v60, %v1718_v61  ;;  %v2392_v0 = vpop.f32.mrb[43].mxu0 }
 0x7d6   :  { %1979 = vmatprep.mubr.bf16.mxu1 %v1726_v62 }
 0x7d7   :  { %1980 = vmatmul.mubr.bf16.gmra.mrb[40].mxu1 %v948_v33 }
 0x8a2   :  { %v1971_v7 = vpop.f32.mrb[36].mxu1 }
 0x8a3   :  { %v1972_v25 = vadd.f32 %v1971_v7, %v1770_v5  ;;  %v1973_v27 = vpop.f32.mrb[37].mxu1 }
 0x8a4   :  { %v1974_v28 = vadd.f32 %v1973_v27, %v1774_v6  ;;  %v1975_v8 = vpop.f32.mrb[38].mxu1 }
 0x8a5   :  { %1990 = vst [vmem:[#allocation18] sm:$0xff] %v1972_v25  ;;  %v1976_v9 = vadd.f32 %v1975_v8, %v1770_v5  ;;  %v1977_v10 = vpop.f32.mrb[39].mxu1 }
 0x8a6   :  { %1991 = vst [vmem:[#allocation18 + $0x8] sm:$0xff] %v1974_v28  ;;  %v1978_v12 = vadd.f32 %v1977_v10, %v1774_v6 }
 0x8a7   :  { %1992 = vst [vmem:[#allocation18 + $0x10] sm:$0xff] %v1976_v9 }
 0x8a8   :  { %1993 = vst [vmem:[#allocation18 + $0x18] sm:$0xff] %v1978_v12 }
 0x8aa   :  { %v1981_v30 = vpop.f32.mrb[40].mxu1 }
 0x8ab   :  { %v1982_v32 = vadd.f32 %v1981_v30, %v1770_v5  ;;  %v1983_v33 = vpop.f32.mrb[41].mxu1 }
 0x8ac   :  { %v1984_v13 = vadd.f32 %v1983_v33, %v1774_v6  ;;  %v1985_v14 = vpop.f32.mrb[42].mxu1 }
 0x8ad   :  { %1994 = vst [vmem:[#allocation18 + $0x20] sm:$0xff] %v1982_v32  ;;  %v1986_v15 = vadd.f32 %v1985_v14, %v1770_v5  ;;  %v1987_v16 = vpop.f32.mrb[43].mxu1 }
 0x8ae   :  { %1995 = vst [vmem:[#allocation18 + $0x28] sm:$0xff] %v1984_v13  ;;  %v1988_v17 = vadd.f32 %v1987_v16, %v1774_v6 }
 0x8af   :  { %1996 = vst [vmem:[#allocation18 + $0x30] sm:$0xff] %v1986_v15 }
 0x8b0   :  { %1997 = vst [vmem:[#allocation18 + $0x38] sm:$0xff] %v1988_v17 }
 0x8b1   :  { %2803 = shalt.err (!%p2800_p6)
}
 0x8b2   :  { %s2804_s2 = scalar_lea.hbm %s3157_s9, 1024 }
 0x8b3   :  { %p2805_p7 = scmp.ne.s32.totalorder %s3157_s9, %s2804_s2  ;;  %p2808_p8 = scmp.lt.u32.totalorder %s2804_s2, %s3157_s9 }
 0x8b5   :  { %p2810_p9 = pnand %p2808_p8, %p2805_p7 }
 0x8b7   :  { %2813 = shalt.err (!%p2810_p9)
}
 0x8b8   :  { %s2840_s28 = smov 256   ;;  %s2841_s29 = smov 16  }
 0x8b9   :  { %2009 = dma.vmem_to_hbm [thread:$0]  %s2004_s25, 1024, %s3157_s9, [#allocation5], %s2840_s28, %s2840_s28, %s2841_s29  }
 0x8ba   :  { %2824 = dma.done.wait [#allocation5], 1024  }
 0x8bb   :  { %2825 = vsyncadd [#allocation5], 4294966272 }
 0x8bc   :  { %2013 = vsyncpa [#allocation4], 1 }
 0x8bd   :  { %2014 = vsyncpa [#allocation7], 1 }
 0x8be   :  { %2015 = vsyncpa [#allocation10], 1 }
 0x8bf   :  { %2016 = vsyncpa [#allocation13], 1 }
 0x8c0   :  { %2017 = vsyncpa [#allocation16], 1 }
 0x8c1   :  { %2018 = vsyncpa [#allocation5], 1 }

</bundles_post_ra>
